<compile_context>
chip_gen: v5e
topology: v5e:2x2
jax: 0.10.0
libtpu: 0.0.40
codegen_flags: <defaults>
</compile_context>

<pallas_src>
import math
import functools

import jax
import jax.numpy as jnp
from jax.experimental import pallas as pl
from jax.experimental.pallas import tpu as pltpu


def _cstim_kernel(alpha_ref, w1_ref, w2_ref, w3_ref, x_ref, f_ref, out_ref,
                  *, T, HW):
    """Grid = (B,). Per step: the full (C, T*HW) slab of one batch element."""
    hp = jax.lax.Precision.HIGHEST

    x = x_ref[...]                                   # (C, T*HW) weights_t slab
    f = f_ref[...]                                   # (C, T*HW) f_historys slab

    # conv_1 (1x1x1) for ALL t in one MXU matmul: (C, C) @ (C, T*HW).
    att1 = jnp.dot(w1_ref[...], x,
                   preferred_element_type=jnp.float32, precision=hp)

    # tem[c, t] = sum_{hw} x[c, t*HW + hw]: static 128-aligned lane slices +
    # XLU lane reductions, concatenated into a (C, T) matrix so the att2 path
    # is batched over T.
    tem = jnp.concatenate(
        [jnp.sum(x[:, t * HW:(t + 1) * HW], axis=1, keepdims=True)
         for t in range(T)],
        axis=1)                                                       # (C, T)

    # conv_2: conv -> PReLU -> conv -> sigmoid on tem, batched over T.
    h = jnp.dot(w2_ref[...], tem,
                preferred_element_type=jnp.float32, precision=hp)     # (C, T)
    a = alpha_ref[0]                                                  # PReLU slope
    h = jnp.where(h > 0, h, a * h)
    att2 = jax.nn.sigmoid(
        jnp.dot(w3_ref[...], h,
                preferred_element_type=jnp.float32, precision=hp))    # (C, T)

    # result[c, hw] = sum_t att2[c, t] * f[c, t*HW+hw] * att1[c, t*HW+hw]
    g = f * att1                                                      # (C, T*HW)
    acc = att2[:, 0:1] * g[:, 0:HW]
    for t in range(1, T):
        acc = acc + att2[:, t:t + 1] * g[:, t * HW:(t + 1) * HW]
    out_ref[...] = acc                                                # (C, HW)


def cstim_forward(weights_t, f_historys, params):
    """Pallas CSTIM forward. Inputs/outputs in PyTorch NCTHW/NCHW layout."""
    B, C, T, H, W = weights_t.shape
    HW = H * W
    THW = T * HW

    # Native layout: only free contiguous reshapes, no transposes.
    x = weights_t.reshape(B, C, THW)
    f = f_historys.reshape(B, C, THW)

    w1, w2, w3 = params["w1"], params["w2"], params["w3"]   # (C_out, C_in)
    alpha = params["alpha"]                                 # (1,) PReLU slope

    kernel = functools.partial(_cstim_kernel, T=T, HW=HW)

    out = pl.pallas_call(
        kernel,
        out_shape=jax.ShapeDtypeStruct((B, C, HW), jnp.float32),
        grid_spec=pltpu.PrefetchScalarGridSpec(
            num_scalar_prefetch=0,
            grid=(B,),
            in_specs=[
                pl.BlockSpec(memory_space=pltpu.MemorySpace.SMEM),   # alpha (1,)
                pl.BlockSpec((C, C), lambda b: (0, 0)),              # W1
                pl.BlockSpec((C, C), lambda b: (0, 0)),              # W2
                pl.BlockSpec((C, C), lambda b: (0, 0)),              # W3
                pl.BlockSpec((None, C, THW), lambda b: (b, 0, 0)),   # weights_t
                pl.BlockSpec((None, C, THW), lambda b: (b, 0, 0)),   # f_historys
            ],
            out_specs=pl.BlockSpec((None, C, HW), lambda b: (b, 0, 0)),
        ),
        compiler_params=pltpu.CompilerParams(
            dimension_semantics=("parallel",)),
    )(alpha, w1, w2, w3, x, f)

    # (B, C, HW) -> (B, C, H, W): free reshape, matches PyTorch result layout.
    return out.reshape(B, C, H, W)


def cstim_reference(weights_t, f_historys, params):
    """Pure-JAX reference mirroring the PyTorch forward."""
    w1, w2, w3 = params["w1"], params["w2"], params["w3"]
    alpha = params["alpha"][0]
    hp = jax.lax.Precision.HIGHEST

    tem = jnp.sum(weights_t, axis=(3, 4))                        # (B, C, T)
    att1 = jnp.einsum('oc,bcthw->bothw', w1, weights_t, precision=hp)
    h = jnp.einsum('oc,bct->bot', w2, tem, precision=hp)
    h = jnp.where(h > 0, h, alpha * h)                           # PReLU
    att2 = jax.nn.sigmoid(jnp.einsum('oc,bct->bot', w3, h, precision=hp))
    weights_f = att1 * att2[:, :, :, None, None]
    return (f_historys * weights_f).sum(axis=2)                  # (B, C, H, W)


def init_params(num_hidden, key):
    """Deterministic parameter init (shapes as in the PyTorch module)."""
    k1, k2, k3 = jax.random.split(key, 3)
    bound = 1.0 / math.sqrt(num_hidden)      # PyTorch Conv default init range
    u = functools.partial(jax.random.uniform, shape=(num_hidden, num_hidden),
                          minval=-bound, maxval=bound, dtype=jnp.float32)
    return {
        "w1": u(k1),                                   # conv_1 weight
        "w2": u(k2),                                   # conv_2[0] weight
        "w3": u(k3),                                   # conv_2[2] weight
        "alpha": jnp.full((1,), 0.25, jnp.float32),    # PReLU default slope
    }


if __name__ == "__main__":
    B, C, T, H, W = 2, 32, 4, 16, 16         # num_hidden = 32, HW = 256 (lane-dense)

    key = jax.random.PRNGKey(0)
    kp, kx, kf = jax.random.split(key, 3)
    params = init_params(C, kp)

    weights_t = jax.random.normal(kx, (B, C, T, H, W), dtype=jnp.float32)
    f_historys = jax.random.normal(kf, (B, C, T, H, W), dtype=jnp.float32)

    out = cstim_forward(weights_t, f_historys, params)
    out = jax.block_until_ready(out)

    ref = cstim_reference(weights_t, f_historys, params)
    err = float(jnp.max(jnp.abs(out - ref)))
    assert out.shape == (B, C, H, W), out.shape
    assert err < 1e-4, f"max abs err {err}"

    print("KERNEL_OK")
</pallas_src>

<mosaic_0001>
module attributes {stable_mosaic.version = 11 : i64} {
  func.func @_cstim_kernel(%arg0: i32, %arg1: memref<1xf32, #tpu.memory_space<smem>>, %arg2: memref<32x32xf32, #tpu.memory_space<vmem>>, %arg3: memref<32x32xf32, #tpu.memory_space<vmem>>, %arg4: memref<32x32xf32, #tpu.memory_space<vmem>>, %arg5: memref<1x32x1024xf32, #tpu.memory_space<vmem>>, %arg6: memref<1x32x1024xf32, #tpu.memory_space<vmem>>, %arg7: memref<1x32x256xf32, #tpu.memory_space<vmem>>) attributes {dimension_semantics = [#tpu.dimension_semantics<parallel>], iteration_bounds = array<i64: 2>, scalar_prefetch = 0 : i64, scratch_operands = 0 : i64, tpu.core_type = #tpu.core_type<tc>, window_params = [{transform_indices = @transform_0, window_bounds = array<i64: 1>}, {pipeline_mode = #tpu.pipeline_mode<synchronous>, transform_indices = @transform_1, window_bounds = array<i64: 32, 32>}, {pipeline_mode = #tpu.pipeline_mode<synchronous>, transform_indices = @transform_2, window_bounds = array<i64: 32, 32>}, {pipeline_mode = #tpu.pipeline_mode<synchronous>, transform_indices = @transform_3, window_bounds = array<i64: 32, 32>}, {transform_indices = @transform_4, window_bounds = array<i64: 1, 32, 1024>}, {transform_indices = @transform_5, window_bounds = array<i64: 1, 32, 1024>}, {transform_indices = @transform_6, window_bounds = array<i64: 1, 32, 256>}]} {
    %c0 = arith.constant 0 : index
    %c0_0 = arith.constant 0 : index
    %c0_1 = arith.constant 0 : index
    %0 = vector.load %arg5[%c0, %c0_0, %c0_1] : memref<1x32x1024xf32, #tpu.memory_space<vmem>>, vector<1x32x1024xf32>
    %1 = vector.shape_cast %0 : vector<1x32x1024xf32> to vector<32x1024xf32>
    %c0_2 = arith.constant 0 : index
    %c0_3 = arith.constant 0 : index
    %c0_4 = arith.constant 0 : index
    %2 = vector.load %arg6[%c0_2, %c0_3, %c0_4] : memref<1x32x1024xf32, #tpu.memory_space<vmem>>, vector<1x32x1024xf32>
    %3 = vector.shape_cast %2 : vector<1x32x1024xf32> to vector<32x1024xf32>
    %c0_5 = arith.constant 0 : index
    %c0_6 = arith.constant 0 : index
    %4 = vector.load %arg2[%c0_5, %c0_6] : memref<32x32xf32, #tpu.memory_space<vmem>>, vector<32x32xf32>
    %cst = arith.constant dense<0.000000e+00> : vector<32x1024xf32>
    %5 = tpu.matmul %4, %1, %cst {dimension_numbers = #tpu.dot_dimension_numbers<[1], [0], [0], [1], [0, 0, 1, 1], [], []>, precision = #tpu.contract_precision<fp32>} : vector<32x32xf32>, vector<32x1024xf32>, vector<32x1024xf32> -> vector<32x1024xf32>
    %6 = vector.extract_strided_slice %1 {offsets = [0, 0], sizes = [32, 256], strides = [1, 1]} : vector<32x1024xf32> to vector<32x256xf32>
    %cst_7 = arith.constant dense<0.000000e+00> : vector<32xf32>
    %7 = vector.multi_reduction <add>, %6, %cst_7 [1] : vector<32x256xf32> to vector<32xf32>
    %8 = vector.shape_cast %7 : vector<32xf32> to vector<32x1xf32>
    %9 = vector.extract_strided_slice %1 {offsets = [0, 256], sizes = [32, 256], strides = [1, 1]} : vector<32x1024xf32> to vector<32x256xf32>
    %cst_8 = arith.constant dense<0.000000e+00> : vector<32xf32>
    %10 = vector.multi_reduction <add>, %9, %cst_8 [1] : vector<32x256xf32> to vector<32xf32>
    %11 = vector.shape_cast %10 : vector<32xf32> to vector<32x1xf32>
    %12 = vector.extract_strided_slice %1 {offsets = [0, 512], sizes = [32, 256], strides = [1, 1]} : vector<32x1024xf32> to vector<32x256xf32>
    %cst_9 = arith.constant dense<0.000000e+00> : vector<32xf32>
    %13 = vector.multi_reduction <add>, %12, %cst_9 [1] : vector<32x256xf32> to vector<32xf32>
    %14 = vector.shape_cast %13 : vector<32xf32> to vector<32x1xf32>
    %15 = vector.extract_strided_slice %1 {offsets = [0, 768], sizes = [32, 256], strides = [1, 1]} : vector<32x1024xf32> to vector<32x256xf32>
    %cst_10 = arith.constant dense<0.000000e+00> : vector<32xf32>
    %16 = vector.multi_reduction <add>, %15, %cst_10 [1] : vector<32x256xf32> to vector<32xf32>
    %17 = vector.shape_cast %16 : vector<32xf32> to vector<32x1xf32>
    %18 = tpu.concatenate %8, %11, %14, %17 in 1 : vector<32x1xf32>, vector<32x1xf32>, vector<32x1xf32>, vector<32x1xf32> -> vector<32x4xf32>
    %c0_11 = arith.constant 0 : index
    %c0_12 = arith.constant 0 : index
    %19 = vector.load %arg3[%c0_11, %c0_12] : memref<32x32xf32, #tpu.memory_space<vmem>>, vector<32x32xf32>
    %cst_13 = arith.constant dense<0.000000e+00> : vector<32x4xf32>
    %20 = tpu.matmul %19, %18, %cst_13 {dimension_numbers = #tpu.dot_dimension_numbers<[1], [0], [0], [1], [0, 0, 1, 1], [], []>, precision = #tpu.contract_precision<fp32>} : vector<32x32xf32>, vector<32x4xf32>, vector<32x4xf32> -> vector<32x4xf32>
    %c0_14 = arith.constant 0 : index
    %21 = memref.load %arg1[%c0_14] : memref<1xf32, #tpu.memory_space<smem>>
    %cst_15 = arith.constant 0.000000e+00 : f32
    %22 = vector.broadcast %cst_15 : f32 to vector<32x4xf32>
    %23 = arith.cmpf ogt, %20, %22 : vector<32x4xf32>
    %24 = vector.broadcast %21 : f32 to vector<32x4xf32>
    %25 = arith.mulf %24, %20 : vector<32x4xf32>
    %26 = arith.select %23, %20, %25 : vector<32x4xi1>, vector<32x4xf32>
    %c0_16 = arith.constant 0 : index
    %c0_17 = arith.constant 0 : index
    %27 = vector.load %arg4[%c0_16, %c0_17] : memref<32x32xf32, #tpu.memory_space<vmem>>, vector<32x32xf32>
    %cst_18 = arith.constant dense<0.000000e+00> : vector<32x4xf32>
    %28 = tpu.matmul %27, %26, %cst_18 {dimension_numbers = #tpu.dot_dimension_numbers<[1], [0], [0], [1], [0, 0, 1, 1], [], []>, precision = #tpu.contract_precision<fp32>} : vector<32x32xf32>, vector<32x4xf32>, vector<32x4xf32> -> vector<32x4xf32>
    %29 = arith.negf %28 : vector<32x4xf32>
    %30 = math.exp %29 : vector<32x4xf32>
    %cst_19 = arith.constant 1.000000e+00 : f32
    %31 = vector.broadcast %cst_19 : f32 to vector<32x4xf32>
    %32 = arith.addf %31, %30 : vector<32x4xf32>
    %33 = arith.divf %31, %32 : vector<32x4xf32>
    %34 = arith.mulf %3, %5 : vector<32x1024xf32>
    %35 = vector.extract_strided_slice %33 {offsets = [0, 0], sizes = [32, 1], strides = [1, 1]} : vector<32x4xf32> to vector<32x1xf32>
    %36 = vector.extract_strided_slice %34 {offsets = [0, 0], sizes = [32, 256], strides = [1, 1]} : vector<32x1024xf32> to vector<32x256xf32>
    %37 = vector.broadcast %35 : vector<32x1xf32> to vector<32x256xf32>
    %38 = arith.mulf %37, %36 : vector<32x256xf32>
    %39 = vector.extract_strided_slice %33 {offsets = [0, 1], sizes = [32, 1], strides = [1, 1]} : vector<32x4xf32> to vector<32x1xf32>
    %40 = vector.extract_strided_slice %34 {offsets = [0, 256], sizes = [32, 256], strides = [1, 1]} : vector<32x1024xf32> to vector<32x256xf32>
    %41 = vector.broadcast %39 : vector<32x1xf32> to vector<32x256xf32>
    %42 = arith.mulf %41, %40 : vector<32x256xf32>
    %43 = arith.addf %38, %42 : vector<32x256xf32>
    %44 = vector.extract_strided_slice %33 {offsets = [0, 2], sizes = [32, 1], strides = [1, 1]} : vector<32x4xf32> to vector<32x1xf32>
    %45 = vector.extract_strided_slice %34 {offsets = [0, 512], sizes = [32, 256], strides = [1, 1]} : vector<32x1024xf32> to vector<32x256xf32>
    %46 = vector.broadcast %44 : vector<32x1xf32> to vector<32x256xf32>
    %47 = arith.mulf %46, %45 : vector<32x256xf32>
    %48 = arith.addf %43, %47 : vector<32x256xf32>
    %49 = vector.extract_strided_slice %33 {offsets = [0, 3], sizes = [32, 1], strides = [1, 1]} : vector<32x4xf32> to vector<32x1xf32>
    %50 = vector.extract_strided_slice %34 {offsets = [0, 768], sizes = [32, 256], strides = [1, 1]} : vector<32x1024xf32> to vector<32x256xf32>
    %51 = vector.broadcast %49 : vector<32x1xf32> to vector<32x256xf32>
    %52 = arith.mulf %51, %50 : vector<32x256xf32>
    %53 = arith.addf %48, %52 : vector<32x256xf32>
    %c0_20 = arith.constant 0 : index
    %c0_21 = arith.constant 0 : index
    %c0_22 = arith.constant 0 : index
    %54 = vector.load %arg7[%c0_20, %c0_21, %c0_22] : memref<1x32x256xf32, #tpu.memory_space<vmem>>, vector<1x32x256xf32>
    %55 = vector.shape_cast %54 : vector<1x32x256xf32> to vector<32x256xf32>
    %56 = vector.shape_cast %53 : vector<32x256xf32> to vector<1x32x256xf32>
    tpu.vector_store %arg7[%c0_20, %c0_21, %c0_22], %56 {strides = array<i32>} : memref<1x32x256xf32, #tpu.memory_space<vmem>>, vector<1x32x256xf32>,
    return
  }
  func.func @transform_0(%arg0: i32) -> i32 {
    %c0_i32 = arith.constant 0 : i32
    %c0_i32_0 = arith.constant 0 : i32
    return %c0_i32 : i32
  }
  func.func @transform_1(%arg0: i32) -> (i32, i32) {
    %c0_i32 = arith.constant 0 : i32
    %c0_i32_0 = arith.constant 0 : i32
    %c0_i32_1 = arith.constant 0 : i32
    return %c0_i32, %c0_i32_0 : i32, i32
  }
  func.func @transform_2(%arg0: i32) -> (i32, i32) {
    %c0_i32 = arith.constant 0 : i32
    %c0_i32_0 = arith.constant 0 : i32
    %c0_i32_1 = arith.constant 0 : i32
    return %c0_i32, %c0_i32_0 : i32, i32
  }
  func.func @transform_3(%arg0: i32) -> (i32, i32) {
    %c0_i32 = arith.constant 0 : i32
    %c0_i32_0 = arith.constant 0 : i32
    %c0_i32_1 = arith.constant 0 : i32
    return %c0_i32, %c0_i32_0 : i32, i32
  }
  func.func @transform_4(%arg0: i32) -> (i32, i32, i32) {
    %c0_i32 = arith.constant 0 : i32
    %c0_i32_0 = arith.constant 0 : i32
    %c0_i32_1 = arith.constant 0 : i32
    return %arg0, %c0_i32, %c0_i32_0 : i32, i32, i32
  }
  func.func @transform_5(%arg0: i32) -> (i32, i32, i32) {
    %c0_i32 = arith.constant 0 : i32
    %c0_i32_0 = arith.constant 0 : i32
    %c0_i32_1 = arith.constant 0 : i32
    return %arg0, %c0_i32, %c0_i32_0 : i32, i32, i32
  }
  func.func @transform_6(%arg0: i32) -> (i32, i32, i32) {
    %c0_i32 = arith.constant 0 : i32
    %c0_i32_0 = arith.constant 0 : i32
    %c0_i32_1 = arith.constant 0 : i32
    return %arg0, %c0_i32, %c0_i32_0 : i32, i32, i32
  }
}

</mosaic_0001>

<bundles_post_ra>
// kernel: tpu_custom_call.1
= control target key start
LH: loop header
LB: loop body
LE: loop exit
PB: predicated region body
PF: predicated region fallthrough
CT: control target
= control target key end

     0   :  { %s5414_s0 = inlined_call_operand.<no memory space> [shape: f32[1], index: 0, kind: input, shape index: {}]   ;;  %s5415_s1 = inlined_call_operand.hbm [shape: f32[32,32], index: 1, kind: input, shape index: {}]   ;;  %s5416_s2 = inlined_call_operand.hbm [shape: f32[32,32], index: 2, kind: input, shape index: {}]   ;;  %s5417_s3 = inlined_call_operand.hbm [shape: f32[32,32], index: 3, kind: input, shape index: {}]   ;;  %s5418_s4 = inlined_call_operand.hbm [shape: f32[2,32,1024], index: 4, kind: input, shape index: {}]   ;;  %s5419_s5 = inlined_call_operand.hbm [shape: f32[2,32,1024], index: 5, kind: input, shape index: {}]   ;;  %s5420_s6 = inlined_call_operand.hbm [shape: f32[2,32,256], index: 6, kind: output, shape index: {}]  }
   0x1   :  { %5432 = sst [smem:[#allocation67_spill]] %s5416_s2 }
   0x2   :  { %5433 = sst [smem:[#allocation68_spill]] %s5418_s4 }
   0x3   :  { %11 = sst [smem:[#allocation2]] %s5414_s0 }
   0x4   :  { %12 = vsyncpa [#allocation4], 0 }
   0x5   :  { %13 = vsyncpa [#allocation7], 0 }
   0x6   :  { %14 = vsyncpa [#allocation10], 0 }
   0x7   :  { %16 = vsyncpa [#allocation10 + $0x1], 0 }
   0x8   :  { %17 = vsyncpa [#allocation5], 0 }
   0x9   :  { %19 = vsyncpa [#allocation5 + $0x1], 0  ;;  %s4144_s23 = smov 0   ;;  %s4146_s24 = smov 0  }
   0xa   :  { %s4148_s25 = smov 0   ;;  %s4150_s26 = smov 0  }
   0xb LB: > { %5434 = sst [smem:[#allocation17_spill]] %s4087_s25  ;;  %s4165_s0 = sadd.s32 4294967295, %s4091_s26   ;;  %s4091_s26 = sphi %s4150_s26, %s5548_s26   ;;  %s4087_s25 = sphi %s4148_s25, %s5550_s25   ;;  %s4083_s24 = sphi %s4146_s24, %s5552_s24   ;;  %s4079_s23 = sphi %s4144_s23, %s5551_s23  }
   0xc   : > { %s3712_s27 = sadd.s32 4294967294, %s4091_s26   ;;  %p129_p0 = scmp.ne.s32.totalorder %s4083_s24, %s4079_s23 }
   0xd   : > { %p5426_p1 = scmp.eq.s32.totalorder %s4165_s0, 0  ;;  %p179_p2 = scmp.eq.s32.totalorder %s4165_s0, 1 }
   0xe   : > { %p185_p3 = scmp.eq.s32.totalorder %s3712_s27, 1  ;;  %p3713_p5 = scmp.ge.s32.totalorder %s4091_s26, 1 }
   0xf   : > { %p4174_p4 = por %p5426_p1, %p129_p0  ;;  %p192_p7 = scmp.lt.s32.totalorder %s4091_s26, 3 }
  0x10   : > { %p4179_p6 = por %p185_p3, %p129_p0  ;;  %s5439_s2 = sld [smem:[#allocation67_spill]] }
  0x11   : > { %p4184_p8 = pnand %p3713_p5, %p192_p7  ;;  %s4093_s10 = smov [#allocation6]  }
  0x12   : > { %s5436_s29 = scalar_select %p4179_p6, 1, 0 }
  0x13   : > { %p3761_p9 = pneg %p4184_p8  ;;  %s222_s11 = sshll.u32 %s4093_s10, 4  ;;  %s223_s11 = int_to_ptr.vmem [resolvable:$true] %s222_s11 }
  0x14   : > { %5437 = sst [smem:[#allocation18_spill]] %s5436_s29  ;;  %s4201_s13 = sadd.s32 1, %s4091_s26  }
  0x15   : > { %p4196_p11 = pnand %p3761_p9, %p5426_p1  ;;  %5441 = sst [smem:[#allocation19_spill]] %s4201_s13 }
  0x16   : > { %s220_s9 = sshll.u32 %s5439_s2, 4  ;;  %s5421_s14 = smov 128   ;;  %s221_s9 = int_to_ptr.hbm [resolvable:$true] %s220_s9 }
  0x17   : > { %s5423_s15 = smov 8   ;;  %s113_s16 = ssub.s32 %s4091_s26, %s4201_s13 }
  0x18   : > { %3767 = dma.hbm_to_vmem [thread:$0]  (!%p4196_p11), %s221_s9, 512, %s223_s11, [#allocation7], %s5421_s14, %s5421_s14, %s5423_s15  }
  0x19   : > { %s116_s17 = sadd.s32 1, %s4087_s25  ;;  %p114_p12 = scmp.eq.s32.totalorder %s113_s16, 0 }
  0x1a   : > { %p123_p13 = scmp.ne.s32.totalorder %s4087_s25, %s4083_s24  ;;  %p124_p0 = scmp.eq.s32.totalorder %s4091_s26, 0 }
  0x1b   : > { %p3785_p3 = scmp.lt.s32.totalorder %s4091_s26, 2  ;;  %s250_s20 = sand.u32 1, %s4091_s26  }
  0x1c   : > { %s4216_s18 = scalar_select %p114_p12, %s4087_s25, %s116_s17  }
  0x1d   : > { %p125_p5 = por %p124_p0, %p123_p13  ;;  %p4220_p7 = por %p179_p2, %p123_p13 }
  0x1e   : > { %5442 = sst [smem:[#allocation20_spill]] %s4216_s18  ;;  %s252_s21 = sand.u32 1, %s4087_s25  }
  0x1f   : > { %s4226_s22 = sshll.u32 %s252_s21, 8  ;;  %s5425_s27 = sshll.u32 %s4091_s26, 8 }
  0x20   : > { %s5444_s4 = sld [smem:[#allocation68_spill]]  ;;  %s254_s10 = scalar_lea.vmem [#allocation9], %s4226_s22 }
  0x21   : > { %s262_s11 = sshll.u32 %s254_s10, 4  ;;  %p4237_p2 = pnand %p3785_p3, %p125_p5  ;;  %s263_s11 = int_to_ptr.vmem [resolvable:$true] %s262_s11 }
  0x22   : > { %s4241_s21 = scalar_lea.sflag [#allocation10], %s250_s20 }
  0x23   : > { %p3901_p12 = pneg %p4237_p2 }
  0x26   : > { %s259_s9 = scalar_lea.hbm %s5444_s4, %s5425_s27 }
  0x27   : > { %s260_s16 = sshll.u32 %s259_s9, 4  ;;  %s3904_s9 = scalar_lea.hbm %s5444_s4, 512  ;;  %s261_s16 = int_to_ptr.hbm [resolvable:$true] %s260_s16 }
  0x28   : > { %s3897_s14 = sshra.s32 %s261_s16, 4  ;;  %s3898_s14 = int_to_ptr.hbm [resolvable:$true] %s3897_s14 }
  0x29   : > { %s3899_s15 = scalar_lea.hbm %s3898_s14, 256  ;;  %p3905_p3 = scmp.lt.s32.totalorder %s3898_s14, %s5444_s4 }
  0x2a   : > { %p3900_p9 = scmp.ne.s32.totalorder %s3898_s14, %s3899_s15  ;;  %p3906_p5 = scmp.lt.s32.totalorder %s3904_s9, %s3899_s15 }
  0x2c   : > { %p3902_p13 = pnand %p3901_p12, %p3900_p9  ;;  %p3907_p10 = por %p3906_p5, %p3905_p3 }
  0x2e   : > { %p3903_p0 = pneg %p3902_p13 }
  0x30   : > { %p3908_p1 = pnand %p3907_p10, %p3903_p0 }
  0x32   : > { %3911 = shalt.err (!%p3908_p1)
}
  0x33   : > { %s5431_s20 = smov 1024   ;;  %s4097_s2 = smov 64  }
  0x34   : > { %3774 = dma.hbm_to_vmem [thread:$0]  (!%p4237_p2), %s261_s16, 4096, %s263_s11, %s4241_s21, %s5431_s20, %s5431_s20, %s4097_s2  }
  0x35   : > { %s5446_s7 = sshll.u32 %s4091_s26, 8  ;;  %s276_s15 = scalar_lea.vmem [#allocation11], %s4226_s22 }
  0x36   : > { %s281_s14 = scalar_lea.hbm %s5419_s5, %s5446_s7  ;;  %s4266_s9 = sshll.u32 %s276_s15, 4  ;;  %s285_s9 = int_to_ptr.vmem [resolvable:$true] %s4266_s9 }
  0x37   : > { %s282_s10 = sshll.u32 %s281_s14, 4  ;;  %s206_s25 = sshll.u32 %s5415_s1, 4  ;;  %s207_s25 = int_to_ptr.hbm [resolvable:$true] %s206_s25  ;;  %s283_s10 = int_to_ptr.hbm [resolvable:$true] %s282_s10 }
  0x38   : > { %s4098_s13 = smov [#allocation3]   ;;  %s234_s20 = sshll.u32 %s5417_s3, 4  ;;  %s235_s20 = int_to_ptr.hbm [resolvable:$true] %s234_s20 }
  0x39   : > { %s208_s29 = sshll.u32 %s4098_s13, 4  ;;  %s5447_s22 = smov 8   ;;  %s209_s29 = int_to_ptr.vmem [resolvable:$true] %s208_s29 }
  0x3a   : > { %s5448_s7 = smov 128   ;;  %s4099_s8 = smov [#allocation8]  }
  0x3b   : > { %3764 = dma.hbm_to_vmem [thread:$0]  (!%p4196_p11), %s207_s25, 512, %s209_s29, [#allocation4], %s5448_s7, %s5448_s7, %s5447_s22  }
  0x3c   : > { %s236_s4 = sshll.u32 %s4099_s8, 4  ;;  %s3987_s13 = sshra.s32 %s283_s10, 4  ;;  %s237_s4 = int_to_ptr.vmem [resolvable:$true] %s236_s4  ;;  %s3988_s13 = int_to_ptr.hbm [resolvable:$true] %s3987_s13 }
  0x3d   : > { %3770 = dma.hbm_to_vmem [thread:$0]  (!%p4196_p11), %s235_s20, 512, %s237_s4, [#allocation7], %s5448_s7, %s5448_s7, %s5447_s22  }
  0x3e   : > { %s3989_s18 = scalar_lea.hbm %s3988_s13, 256  ;;  %s3994_s29 = scalar_lea.hbm %s5419_s5, 512 }
  0x3f   : > { %p3990_p1 = scmp.ne.s32.totalorder %s3988_s13, %s3989_s18  ;;  %p3995_p13 = scmp.lt.s32.totalorder %s3988_s13, %s5419_s5 }
  0x40   : > { %p3996_p0 = scmp.lt.s32.totalorder %s3994_s29, %s3989_s18 }
  0x41   : > { %p3992_p10 = pnand %p3990_p1, %p3901_p12 }
  0x42   : > { %p3997_p3 = por %p3996_p0, %p3995_p13 }
  0x43   : > { %p3993_p9 = pneg %p3992_p10 }
  0x45   : > { %p3998_p5 = pnand %p3997_p3, %p3993_p9 }
  0x47   : > { %4001 = shalt.err (!%p3998_p5)
}
  0x48   : > { %s5449_s12 = smov 1024   ;;  %296 = sbr.rel (%p4184_p8) target bundleno = 1059 (0x423), region = 44 }
  0x49   : > { %3777 = dma.hbm_to_vmem [thread:$0]  (!%p4237_p2), %s283_s10, 4096, %s285_s9, %s4241_s21, %s5449_s12, %s5449_s12, %s4097_s2  }
  0x4d   : > { %p5450_p11 = scmp.eq.s32.totalorder %s4165_s0, 0 }
  0x4f   : > { %4062 = dma.done.wait (%p5450_p11), [#allocation4], 512   ;;  %p5451_p12 = pmov %p5450_p11 }
  0x50   : > { %p5452_p1 = pmov %p5450_p11 }
  0x51   : > { %4064 = vsyncadd (%p5451_p12), [#allocation4], 4294966784 }
  0x52   : > { %4066 = dma.done.wait (%p5452_p1), [#allocation7], 1024   ;;  %p5453_p10 = pmov %p5452_p1 }
  0x53   : > { %s313_s17 = sand.u32 1, %s4165_s0   ;;  %s4312_s2 = sand.u32 1, %s4083_s24  }
  0x54   : > { %4068 = vsyncadd (%p5453_p10), [#allocation7], 4294966272  ;;  %s3728_s30 = sshll.u32 %s4312_s2, 8  ;;  %s314_s21 = scalar_lea.sflag [#allocation10], %s313_s17 }
  0x55   : > { %s4317_s20 = scalar_lea.vmem [#allocation9], %s3728_s30 }
  0x56   : > { %4070 = dma.done.wait (%p4174_p4), %s314_s21, 8192  }
  0x57   : > { %4072 = vsyncadd (%p4174_p4), %s314_s21, 4294959104  ;;  %vm430_vm0 = vcmask 261120   ;;  %v4324_v0 = vld [vmem:[%s4317_s20 + $0xc0] sm:$0xff]  ;;  %v427_v8 = vld [vmem:[#allocation3 + $0x8] sm:$0xff]  ;;  %vm2715_vm1 = vcmask 7168   ;;  %vm2720_vm2 = vcmask 15360  }
  0x58   : > { %v4327_v1 = vld [vmem:[%s4317_s20 + $0x80] sm:$0xff]  ;;  %v4333_v3 = vand.u32 4294901760, %v4324_v0  ;;  %v435_v11 = vsel %vm430_vm0, %v427_v8, 0  ;;  %v428_v12 = vld [vmem:[#allocation3 + $0x10] sm:$0xff]  ;;  %v4390_v32 = vld [vmem:[%s4317_s20 + $0xc8] sm:$0xff]  ;;  %vm2725_vm3 = vcmask 23552  }
  0x59   : > { %v4330_v2 = vld [vmem:[%s4317_s20 + $0x40] sm:$0xff]  ;;  %v4336_v4 = vand.u32 4294901760, %v4327_v1  ;;  %v4365_v18 = vand.u32 4294901760, %v435_v11  ;;  %v438_v19 = vsel %vm430_vm0, %v428_v12, 0  ;;  %v4393_v33 = vld [vmem:[%s4317_s20 + $0x88] sm:$0xff]  ;;  %v429_v39 = vld [vmem:[#allocation3 + $0x18] sm:$0xff] }
  0x5a   : > { %v4339_v5 = vand.u32 4294901760, %v4330_v2  ;;  %v4342_v6 = vld [vmem:[%s4317_s20] sm:$0xff]  ;;  %456 = vmatpush.msra.mxu0 %v4333_v3  ;;  %v509_v13 = vsub.f32 %v4324_v0, %v4333_v3  ;;  %607 = vmatpush.msra.mxu3 %v4333_v3  ;;  %v4387_v31 = vand.u32 4294901760, %v438_v19  ;;  %v4396_v34 = vld [vmem:[%s4317_s20 + $0x48] sm:$0xff]  ;;  %v4411_v43 = vand.u32 4294901760, %v4390_v32  ;;  %s3024_s28 = sld [smem:[#allocation2]] }
  0x5b   : > { %v426_v7 = vld [vmem:[#allocation3] sm:$0xff]  ;;  %v4345_v9 = vand.u32 4294901760, %v4342_v6  ;;  %v515_v14 = vsub.f32 %v4327_v1, %v4336_v4  ;;  %v4376_v25 = vsub.f32 %v435_v11, %v4365_v18  ;;  %v4404_v40 = vld [vmem:[%s4317_s20 + $0x8] sm:$0xff]  ;;  %v4414_v44 = vand.u32 4294901760, %v4393_v33  ;;  %s5249_s9 = scalar_lea.vmem [#allocation11], %s3728_s30  ;;  %s3730_s10 = sshll.u32 %s4312_s2, 6 }
  0x5c   : > { %v432_v10 = vsel %vm430_vm0, %v426_v7, 0  ;;  %v4357_v15 = vsub.f32 %v4330_v2, %v4339_v5  ;;  %458 = vmatpush.msra.mxu0 %v4336_v4  ;;  %563 = vmatpush.msra.mxu2 %v509_v13  ;;  %v510_v20 = vand.u32 4294901760, %v509_v13  ;;  %v4417_v45 = vand.u32 4294901760, %v4396_v34  ;;  %s5340_s11 = scalar_lea.vmem [#allocation12], %s3730_s10  ;;  %s3742_s16 = sshll.u32 %s4165_s0, 6 }
  0x5d   : > { %v4359_v16 = vand.u32 4294901760, %v432_v10  ;;  %v4363_v17 = vsub.f32 %v4342_v6, %v4345_v9  ;;  %v516_v22 = vand.u32 4294901760, %v515_v14  ;;  %609 = vmatpush.msra.mxu3 %v4336_v4  ;;  %v4385_v30 = vand.u32 4294901760, %v4376_v25  ;;  %s3584_s8 = scalar_lea.hbm %s5420_s6, %s3742_s16  ;;  %s3585_s0 = sshll.u32 %s5340_s11, 4  ;;  %s3586_s0 = int_to_ptr.vmem [resolvable:$true] %s3585_s0 }
  0x5e   : > { %v522_v23 = vand.u32 4294901760, %v4357_v15  ;;  %460 = vmatpush.msra.mxu0 %v4339_v5  ;;  %566 = vmatpush.msra.mxu2 %v515_v14  ;;  %v511_v26 = vsub.f32 %v509_v13, %v510_v20  ;;  %v4424_v47 = vsub.f32 %v438_v19, %v4387_v31  ;;  %v441_v48 = vsel %vm430_vm0, %v429_v39, 0  ;;  %s3587_s4 = sshll.u32 %s3584_s8, 4  ;;  %s3573_s13 = scalar_lea.sflag [#allocation5], %s4312_s2  ;;  %s3588_s4 = int_to_ptr.hbm [resolvable:$true] %s3587_s4 }
  0x5f   : > { %v4370_v21 = vsub.f32 %v432_v10, %v4359_v16  ;;  %v528_v24 = vand.u32 4294901760, %v4363_v17  ;;  %v517_v28 = vsub.f32 %v515_v14, %v516_v22  ;;  %611 = vmatpush.msra.mxu3 %v4339_v5  ;;  %v474_v46 = vsub.f32 %v4376_v25, %v4385_v30  ;;  %s4031_s18 = sshra.s32 %s3588_s4, 4  ;;  %s4037_s14 = scalar_lea.hbm %s5420_s6, 128  ;;  %s4032_s18 = int_to_ptr.hbm [resolvable:$true] %s4031_s18 }
  0x60   : > { %v523_v29 = vsub.f32 %v4357_v15, %v522_v23  ;;  %462 = vmatpush.msra.mxu0 %v4345_v9  ;;  %v512_v35 = vand.u32 4294901760, %v511_v26  ;;  %569 = vmatpush.msra.mxu2 %v4357_v15  ;;  %v4428_v49 = vand.u32 4294901760, %v4404_v40  ;;  %v787_v51 = vsub.f32 %v4390_v32, %v4411_v43  ;;  %s4033_s27 = scalar_lea.hbm %s4032_s18, 64  ;;  %p4038_p9 = scmp.lt.s32.totalorder %s4032_s18, %s5420_s6 }
  0x61   : > { %v4380_v27 = vand.u32 4294901760, %v4370_v21  ;;  %v518_v37 = vand.u32 4294901760, %v517_v28  ;;  %v529_v38 = vsub.f32 %v4363_v17, %v528_v24  ;;  %613 = vmatpush.msra.mxu3 %v4345_v9  ;;  %v793_v52 = vsub.f32 %v4393_v33, %v4414_v44  ;;  %p4034_p4 = scmp.ne.s32.totalorder %s4032_s18, %s4033_s27  ;;  %p4039_p13 = scmp.lt.s32.totalorder %s4037_s14, %s4033_s27 }
  0x62   : > { %v524_v41 = vand.u32 4294901760, %v523_v29  ;;  %654 = vmatpush.msrb.mxu0 %v510_v20  ;;  %513 = vmatpush.msra.mxu1 %v512_v35  ;;  %v799_v53 = vsub.f32 %v4396_v34, %v4417_v45  ;;  %v805_v54 = vsub.f32 %v4404_v40, %v4428_v49  ;;  %v788_v55 = vand.u32 4294901760, %v787_v51  ;;  %v4506_v20 = vld [vmem:[%s4317_s20 + $0x90] sm:$0xff] }
  0x63   : > { %v466_v36 = vsub.f32 %v4370_v21, %v4380_v27  ;;  %572 = vmatpush.msra.mxu2 %v4363_v17  ;;  %617 = vmatmul.f32.vlgmr.msra.gmra.mxu3 %v4380_v27  ;;  %v530_v50 = vand.u32 4294901760, %v529_v38  ;;  %v794_v56 = vand.u32 4294901760, %v793_v52  ;;  %v4441_v58 = vand.u32 4294901760, %v4424_v47  ;;  %v4519_v35 = vld [vmem:[%s4317_s20 + $0x10] sm:$0xff]  ;;  %p4035_p8 = pnand %p4034_p4, %p4220_p7  ;;  %p4040_p0 = por %p4039_p13, %p4038_p9 }
  0x64   : > { %575 = vmatmul.f32.vlgmr.msra.gmra.mxu2 %v4370_v21  ;;  %519 = vmatpush.msra.mxu1 %v518_v37  ;;  %v800_v57 = vand.u32 4294901760, %v799_v53  ;;  %v4443_v59 = vand.u32 4294901760, %v441_v48  ;;  %v806_v60 = vand.u32 4294901760, %v805_v54  ;;  %v4446_v61 = vand.u32 4294901760, %v474_v46 }
  0x65   : > { %v4407_v42 = vand.u32 4294901760, %v466_v36  ;;  %658 = vmatpush.msrb.mxu0 %v516_v22  ;;  %734 = vmatpush.msrb.mxu2 %v4411_v43  ;;  %v789_v62 = vsub.f32 %v787_v51, %v788_v55  ;;  %v795_v63 = vsub.f32 %v793_v52, %v794_v56  ;;  %v482_v12 = vsub.f32 %v4424_v47, %v4441_v58  ;;  %p4036_p2 = pneg %p4035_p8 }
  0x66   : > { %525 = vmatpush.msra.mxu1 %v524_v41  ;;  %v801_v7 = vsub.f32 %v799_v53, %v800_v57  ;;  %v807_v11 = vsub.f32 %v805_v54, %v806_v60  ;;  %v4457_v13 = vsub.f32 %v441_v48, %v4443_v59  ;;  %v1013_v22 = vand.u32 4294901760, %v4506_v20 }
  0x67   : > { %468 = vmatmul.f32.vlgmr.msra.gmra.mxu0 %v4407_v42  ;;  %736 = vmatpush.msrb.mxu2 %v4414_v44  ;;  %v790_v8 = vand.u32 4294901760, %v789_v62  ;;  %v796_v10 = vand.u32 4294901760, %v795_v63  ;;  %v4462_v15 = vand.u32 4294901760, %v482_v12  ;;  %v1017_v36 = vand.u32 4294901760, %v4519_v35  ;;  %p4041_p3 = pnand %p4040_p0, %p4036_p2 }
  0x68   : > { %662 = vmatpush.msrb.mxu0 %v522_v23  ;;  %531 = vmatpush.msra.mxu1 %v530_v50  ;;  %v802_v14 = vand.u32 4294901760, %v801_v7  ;;  %v4465_v17 = vand.u32 4294901760, %v4457_v13  ;;  %v1071_v28 = vsub.f32 %v4506_v20, %v1013_v22 }
  0x69   : > { %533 = vmatmul.f32.vlgmr.msra.gmra.mxu1 %v4359_v16  ;;  %738 = vmatpush.msrb.mxu2 %v4417_v45 }
  0x6a   : > { %666 = vmatpush.msrb.mxu0 %v528_v24  ;;  %697 = vmatpush.msrb.mxu1 %v4333_v3  ;;  %v808_v3 = vand.u32 4294901760, %v807_v11  ;;  %v4514_v24 = vld [vmem:[%s4317_s20 + $0x50] sm:$0xff]  ;;  %v1072_v39 = vand.u32 4294901760, %v1071_v28 }
  0x6b   : > { %623 = vmatmul.f32.gmra.mxu3 %v4385_v30  ;;  %740 = vmatpush.msrb.mxu2 %v4428_v49  ;;  %v1015_v26 = vand.u32 4294901760, %v4514_v24 }
  0x6c   : > { %580 = vmatmul.f32.gmra.mxu2 %v4376_v25  ;;  %791 = vmatpush.msrb.mxu3 %v790_v8  ;;  %v4555_v8 = vld [vmem:[%s4317_s20 + $0x18] sm:$0xff] }
  0x6d   : > { %699 = vmatpush.msrb.mxu1 %v4336_v4  ;;  %841 = vmatpush.msra.mxu0 %v787_v51  ;;  %v490_v4 = vsub.f32 %v4457_v13, %v4465_v17  ;;  %v1077_v38 = vsub.f32 %v4514_v24, %v1015_v26  ;;  %v1295_v12 = vand.u32 4294901760, %v4555_v8 }
  0x6e   : > { %797 = vmatpush.msrb.mxu3 %v796_v10  ;;  %932 = vmatpush.msra.mxu2 %v788_v55  ;;  %v4541_v55 = vld [vmem:[%s4317_s20 + $0x98] sm:$0xff] }
  0x6f   : > { %476 = vmatmul.f32.gmra.mxu0 %v4446_v61  ;;  %701 = vmatpush.msrb.mxu1 %v4339_v5  ;;  %v4478_v5 = vand.u32 4294901760, %v490_v4 }
  0x70   : > { %803 = vmatpush.msrb.mxu3 %v802_v14  ;;  %844 = vmatpush.msra.mxu0 %v793_v52 }
  0x71   : > { %537 = vmatmul.f32.gmra.mxu1 %v4365_v18  ;;  %936 = vmatpush.msra.mxu2 %v794_v56 }
  0x72   : > { %809 = vmatpush.msrb.mxu3 %v808_v3  ;;  %703 = vmatpush.msrb.mxu1 %v4345_v9  ;;  %v4501_v9 = vld [vmem:[%s4317_s20 + $0xd0] sm:$0xff] }
  0x73   : > { %629 = vmatmul.f32.gmra.mxu3 %v4441_v58  ;;  %847 = vmatpush.msra.mxu0 %v799_v53  ;;  %v1011_v19 = vand.u32 4294901760, %v4501_v9  ;;  %v4537_v53 = vld [vmem:[%s4317_s20 + $0xd8] sm:$0xff] }
  0x74   : > { %585 = vmatmul.f32.gmra.mxu2 %v4424_v47  ;;  %975 = vmatpush.msra.mxu3 %v4411_v43 }
  0x75   : > { %885 = vmatpush.msra.mxu1 %v4411_v43  ;;  %940 = vmatpush.msra.mxu2 %v800_v57  ;;  %v1065_v23 = vsub.f32 %v4501_v9, %v1011_v19  ;;  %v1073_v43 = vsub.f32 %v1071_v28, %v1072_v39  ;;  %v1291_v57 = vand.u32 4294901760, %v4541_v55 }
  0x76   : > { %977 = vmatpush.msra.mxu3 %v4414_v44  ;;  %850 = vmatpush.msra.mxu0 %v805_v54  ;;  %v1289_v54 = vand.u32 4294901760, %v4537_v53 }
  0x77   : > { %484 = vmatmul.f32.gmra.mxu0 %v4462_v15  ;;  %887 = vmatpush.msra.mxu1 %v4414_v44  ;;  %v1066_v29 = vand.u32 4294901760, %v1065_v23  ;;  %v1083_v44 = vsub.f32 %v4519_v35, %v1017_v36  ;;  %v1074_v46 = vand.u32 4294901760, %v1073_v43  ;;  %v1349_v7 = vsub.f32 %v4541_v55, %v1291_v57 }
  0x78   : > { %944 = vmatpush.msra.mxu2 %v806_v60  ;;  %979 = vmatpush.msra.mxu3 %v4417_v45  ;;  %v1343_v56 = vsub.f32 %v4537_v53, %v1289_v54  ;;  %v4547_v60 = vld [vmem:[%s4317_s20 + $0x58] sm:$0xff] }
  0x79   : > { %541 = vmatmul.f32.gmra.mxu1 %v4387_v31  ;;  %v1067_v37 = vsub.f32 %v1065_v23, %v1066_v29  ;;  %v1293_v63 = vand.u32 4294901760, %v4547_v60  ;;  %v1350_v11 = vand.u32 4294901760, %v1349_v7 }
  0x7a   : > { %889 = vmatpush.msra.mxu1 %v4417_v45  ;;  %981 = vmatpush.msra.mxu3 %v4428_v49  ;;  %v1078_v45 = vand.u32 4294901760, %v1077_v38  ;;  %v1344_v62 = vand.u32 4294901760, %v1343_v56 }
  0x7b   : > { %635 = vmatmul.f32.gmra.mxu3 %v4465_v17  ;;  %v1068_v41 = vand.u32 4294901760, %v1067_v37  ;;  %v1355_v14 = vsub.f32 %v4547_v60, %v1293_v63  ;;  %v1351_v4 = vsub.f32 %v1349_v7, %v1350_v11 }
  0x7c   : > { %590 = vmatmul.f32.gmra.mxu2 %v4457_v13  ;;  %891 = vmatpush.msra.mxu1 %v4428_v49  ;;  %v1079_v48 = vsub.f32 %v1077_v38, %v1078_v45  ;;  %v1084_v49 = vand.u32 4294901760, %v1083_v44  ;;  %v1345_v10 = vsub.f32 %v1343_v56, %v1344_v62 }
  0x7e   : > { %v1080_v50 = vand.u32 4294901760, %v1079_v48  ;;  %v1085_v51 = vsub.f32 %v1083_v44, %v1084_v49  ;;  %v1346_v3 = vand.u32 4294901760, %v1345_v10 }
  0x7f   : > { %492 = vmatmul.f32.gmra.mxu0 %v4478_v5 }
  0x80   : > { %v1086_v52 = vand.u32 4294901760, %v1085_v51 }
  0x81   : > { %545 = vmatmul.f32.gmra.mxu1 %v4443_v59 }
  0x83   : > { %811 = vmatmul.f32.vlgmr.msrb.gmra.mxu3 %v4359_v16 }
  0x84   : > { %746 = vmatmul.f32.vlgmr.msrb.gmra.mxu2 %v4407_v42  ;;  %1163 = vmatpush.msrb.mxu3 %v1011_v19 }
  0x85   : > { %1119 = vmatpush.msrb.mxu2 %v1065_v23  ;;  %v1352_v23 = vand.u32 4294901760, %v1351_v4  ;;  %v4597_v4 = vld [vmem:[%s4317_s20 + $0xa0] sm:$0xff] }
  0x86   : > { %1165 = vmatpush.msrb.mxu3 %v1013_v22 }
  0x87   : > { %668 = vmatmul.f32.vlgmr.msrb.gmra.mxu0 %v4359_v16  ;;  %1122 = vmatpush.msrb.mxu2 %v1071_v28 }
  0x88   : > { %1012 = vmatpush.msrb.mxu0 %v1011_v19  ;;  %1167 = vmatpush.msrb.mxu3 %v1015_v26 }
  0x89   : > { %705 = vmatmul.f32.vlgmr.msrb.gmra.mxu1 %v4359_v16  ;;  %1125 = vmatpush.msrb.mxu2 %v1077_v38 }
  0x8a   : > { %1014 = vmatpush.msrb.mxu0 %v1013_v22  ;;  %1169 = vmatpush.msrb.mxu3 %v1017_v36 }
  0x8b   : > { %815 = vmatmul.f32.gmra.mxu3 %v4365_v18  ;;  %1069 = vmatpush.msrb.mxu1 %v1068_v41 }
  0x8c   : > { %754 = vmatmul.f32.gmra.mxu2 %v4446_v61  ;;  %1016 = vmatpush.msrb.mxu0 %v1015_v26 }
  0x8d   : > { %1128 = vmatpush.msrb.mxu2 %v1083_v44  ;;  %1075 = vmatpush.msrb.mxu1 %v1074_v46 }
  0x8e   : > { %1018 = vmatpush.msrb.mxu0 %v1017_v36 }
  0x8f   : > { %672 = vmatmul.f32.gmra.mxu0 %v4365_v18  ;;  %1081 = vmatpush.msrb.mxu1 %v1080_v50 }
  0x91   : > { %709 = vmatmul.f32.gmra.mxu1 %v4365_v18 }
  0x92   : > { %1087 = vmatpush.msrb.mxu1 %v1086_v52 }
  0x93   : > { %819 = vmatmul.f32.gmra.mxu3 %v4387_v31 }
  0x94   : > { %762 = vmatmul.f32.gmra.mxu2 %v4462_v15 }
  0x97   : > { %676 = vmatmul.f32.gmra.mxu0 %v4387_v31 }
  0x99   : > { %713 = vmatmul.f32.gmra.mxu1 %v4387_v31 }
  0x9b   : > { %823 = vmatmul.f32.gmra.mxu3 %v4443_v59 }
  0x9c   : > { %770 = vmatmul.f32.gmra.mxu2 %v4478_v5 }
  0x9f   : > { %680 = vmatmul.f32.gmra.mxu0 %v4443_v59 }
  0xa1   : > { %717 = vmatmul.f32.gmra.mxu1 %v4443_v59 }
  0xa3   : > { %983 = vmatmul.f32.vlgmr.msra.gmra.mxu3 %v4359_v16 }
  0xa4   : > { %946 = vmatmul.f32.vlgmr.msra.gmra.mxu2 %v4359_v16  ;;  %1347 = vmatpush.msra.mxu3 %v1346_v3 }
  0xa5   : > { %1290 = vmatpush.msra.mxu2 %v1289_v54 }
  0xa6   : > { %1353 = vmatpush.msra.mxu3 %v1352_v23 }
  0xa7   : > { %853 = vmatmul.f32.vlgmr.msra.gmra.mxu0 %v4370_v21  ;;  %1292 = vmatpush.msra.mxu2 %v1291_v57 }
  0xa8   : > { %1210 = vmatpush.msra.mxu0 %v1066_v29 }
  0xa9   : > { %895 = vmatmul.f32.vlgmr.msra.gmra.mxu1 %v4380_v27  ;;  %1294 = vmatpush.msra.mxu2 %v1293_v63 }
  0xaa   : > { %1214 = vmatpush.msra.mxu0 %v1072_v39  ;;  %1253 = vmatpush.msra.mxu1 %v1011_v19  ;;  %v1356_v19 = vand.u32 4294901760, %v1355_v14 }
  0xab   : > { %987 = vmatmul.f32.gmra.mxu3 %v4365_v18  ;;  %1296 = vmatpush.msra.mxu2 %v1295_v12 }
  0xac   : > { %1218 = vmatpush.msra.mxu0 %v1078_v45  ;;  %950 = vmatmul.f32.gmra.mxu2 %v4365_v18 }
  0xad   : > { %1255 = vmatpush.msra.mxu1 %v1013_v22  ;;  %v1361_v22 = vsub.f32 %v4555_v8, %v1295_v12 }
  0xae   : > { %1222 = vmatpush.msra.mxu0 %v1084_v49 }
  0xaf   : > { %858 = vmatmul.f32.gmra.mxu0 %v4376_v25  ;;  %1257 = vmatpush.msra.mxu1 %v1015_v26  ;;  %v1357_v26 = vsub.f32 %v1355_v14, %v1356_v19  ;;  %v1362_v28 = vand.u32 4294901760, %v1361_v22 }
  0xb1   : > { %901 = vmatmul.f32.gmra.mxu1 %v4385_v30  ;;  %v1358_v29 = vand.u32 4294901760, %v1357_v26  ;;  %v4609_v26 = vld [vmem:[%s4317_s20 + $0x60] sm:$0xff] }
  0xb2   : > { %1259 = vmatpush.msra.mxu1 %v1017_v36  ;;  %v1363_v36 = vsub.f32 %v1361_v22, %v1362_v28 }
  0xb3   : > { %991 = vmatmul.f32.gmra.mxu3 %v4387_v31 }
  0xb4   : > { %954 = vmatmul.f32.gmra.mxu2 %v4387_v31  ;;  %v1364_v37 = vand.u32 4294901760, %v1363_v36  ;;  %1359 = vmatpush.msra.mxu3 %v1358_v29 }
  0xb6   : > { %1365 = vmatpush.msra.mxu3 %v1364_v37 }
  0xb7   : > { %863 = vmatmul.f32.gmra.mxu0 %v4424_v47 }
  0xb9   : > { %907 = vmatmul.f32.gmra.mxu1 %v4441_v58 }
  0xbb   : > { %995 = vmatmul.f32.gmra.mxu3 %v4443_v59 }
  0xbc   : > { %958 = vmatmul.f32.gmra.mxu2 %v4443_v59 }
  0xbf   : > { %868 = vmatmul.f32.gmra.mxu0 %v4457_v13 }
  0xc1   : > { %913 = vmatmul.f32.gmra.mxu1 %v4465_v17 }
  0xc3   : > { %1173 = vmatmul.f32.vlgmr.msrb.gmra.mxu3 %v4380_v27 }
  0xc4   : > { %1131 = vmatmul.f32.vlgmr.msrb.gmra.mxu2 %v4370_v21  ;;  %1531 = vmatpush.msrb.mxu3 %v1289_v54 }
  0xc5   : > { %1488 = vmatpush.msrb.mxu2 %v1344_v62 }
  0xc6   : > { %1533 = vmatpush.msrb.mxu3 %v1291_v57 }
  0xc7   : > { %1024 = vmatmul.f32.vlgmr.msrb.gmra.mxu0 %v4407_v42  ;;  %1492 = vmatpush.msrb.mxu2 %v1350_v11  ;;  %v390_v11 = vld [vmem:[%s4317_s20 + $0xe0] sm:$0xff] }
  0xc8   : > { %1397 = vmatpush.msrb.mxu0 %v1343_v56  ;;  %1535 = vmatpush.msrb.mxu3 %v1293_v63  ;;  %v4594_v3 = vand.u32 4294901760, %v390_v11 }
  0xc9   : > { %1089 = vmatmul.f32.vlgmr.msrb.gmra.mxu1 %v4359_v16  ;;  %1496 = vmatpush.msrb.mxu2 %v1356_v19 }
  0xca   : > { %1400 = vmatpush.msrb.mxu0 %v1349_v7  ;;  %1441 = vmatpush.msrb.mxu1 %v1289_v54  ;;  %v1621_v23 = vsub.f32 %v390_v11, %v4594_v3 }
  0xcb   : > { %1179 = vmatmul.f32.gmra.mxu3 %v4385_v30  ;;  %1500 = vmatpush.msrb.mxu2 %v1362_v28  ;;  %v4614_v28 = vand.u32 4294901760, %v4609_v26 }
  0xcc   : > { %1403 = vmatpush.msrb.mxu0 %v1355_v14  ;;  %1136 = vmatmul.f32.gmra.mxu2 %v4376_v25  ;;  %v1622_v36 = vand.u32 4294901760, %v1621_v23 }
  0xcd   : > { %1443 = vmatpush.msrb.mxu1 %v1291_v57  ;;  %1537 = vmatpush.msrb.mxu3 %v1295_v12 }
  0xce   : > { %1406 = vmatpush.msrb.mxu0 %v1361_v22  ;;  %v4604_v22 = vand.u32 4294901760, %v4597_v4 }
  0xcf   : > { %1032 = vmatmul.f32.gmra.mxu0 %v4446_v61  ;;  %1445 = vmatpush.msrb.mxu1 %v1293_v63 }
  0xd0   : > { %v1627_v29 = vsub.f32 %v4597_v4, %v4604_v22 }
  0xd1   : > { %1093 = vmatmul.f32.gmra.mxu1 %v4365_v18 }
  0xd2   : > { %1447 = vmatpush.msrb.mxu1 %v1295_v12 }
  0xd3   : > { %1185 = vmatmul.f32.gmra.mxu3 %v4441_v58 }
  0xd4   : > { %1141 = vmatmul.f32.gmra.mxu2 %v4424_v47 }
  0xd7   : > { %1040 = vmatmul.f32.gmra.mxu0 %v4462_v15 }
  0xd9   : > { %1097 = vmatmul.f32.gmra.mxu1 %v4387_v31 }
  0xdb   : > { %1191 = vmatmul.f32.gmra.mxu3 %v4465_v17 }
  0xdc   : > { %1146 = vmatmul.f32.gmra.mxu2 %v4457_v13 }
  0xdf   : > { %1048 = vmatmul.f32.gmra.mxu0 %v4478_v5 }
  0xe1   : > { %1101 = vmatmul.f32.gmra.mxu1 %v4443_v59 }
  0xe3   : > { %1367 = vmatmul.f32.vlgmr.msra.gmra.mxu3 %v4359_v16 }
  0xe4   : > { %v469_v38 = vpop.f32.mrf.mxu0  ;;  %1302 = vmatmul.f32.vlgmr.msra.gmra.mxu2 %v4407_v42  ;;  %1719 = vmatpush.msra.mxu3 %v4594_v3 }
  0xe5   : > { %1675 = vmatpush.msra.mxu2 %v1621_v23 }
  0xe6   : > { %v534_v39 = vpop.f32.mrf.mxu1  ;;  %v618_v44 = vpop.f32.mrf.mxu3  ;;  %1721 = vmatpush.msra.mxu3 %v4604_v22 }
  0xe7   : > { %1224 = vmatmul.f32.vlgmr.msra.gmra.mxu0 %v4359_v16  ;;  %v576_v41 = vpop.f32.mrf.mxu2  ;;  %v535_v43 = vadd.f32 %v534_v39, %v469_v38  ;;  %v4619_v39 = vld [vmem:[%s4317_s20 + $0x20] sm:$0xff]  ;;  %1678 = vmatpush.msra.mxu2 %v1627_v29 }
  0xe8   : > { %1568 = vmatpush.msra.mxu0 %v4594_v3  ;;  %1723 = vmatpush.msra.mxu3 %v4614_v28 }
  0xe9   : > { %v577_v46 = vadd.f32 %v576_v41, %v535_v43  ;;  %1261 = vmatmul.f32.vlgmr.msra.gmra.mxu1 %v4359_v16 }
  0xea   : > { %1570 = vmatpush.msra.mxu0 %v4604_v22 }
  0xeb   : > { %v4581_v48 = vadd.f32 %v618_v44, %v577_v46  ;;  %1371 = vmatmul.f32.gmra.mxu3 %v4365_v18  ;;  %v4624_v44 = vand.u32 4294901760, %v4619_v39  ;;  %v1633_v46 = vsub.f32 %v4609_v26, %v4614_v28 }
  0xec   : > { %v477_v45 = vpop.f32.mrf.mxu0  ;;  %1310 = vmatmul.f32.gmra.mxu2 %v4446_v61  ;;  %1572 = vmatpush.msra.mxu0 %v4614_v28 }
  0xed   : > { %1681 = vmatpush.msra.mxu2 %v1633_v46  ;;  %1725 = vmatpush.msra.mxu3 %v4624_v44 }
  0xee   : > { %v538_v49 = vpop.f32.mrf.mxu1  ;;  %v624_v52 = vpop.f32.mrf.mxu3  ;;  %1574 = vmatpush.msra.mxu0 %v4624_v44 }
  0xef   : > { %1228 = vmatmul.f32.gmra.mxu0 %v4365_v18  ;;  %v581_v50 = vpop.f32.mrf.mxu2  ;;  %v539_v51 = vadd.f32 %v538_v49, %v477_v45  ;;  %v1623_v45 = vsub.f32 %v1621_v23, %v1622_v36  ;;  %v2676_v49 = vadd.f32 %v4390_v32, %v4324_v0 }
  0xf1   : > { %v582_v56 = vadd.f32 %v581_v50, %v539_v51  ;;  %1265 = vmatmul.f32.gmra.mxu1 %v4365_v18  ;;  %v1628_v50 = vand.u32 4294901760, %v1627_v29  ;;  %2677 = vadd.xlane.f32.xlu0 %v2676_v49  ;;  %v2688_v49 = vadd.f32 %v4537_v53, %v4501_v9  ;;  %v2673_v53 = vadd.f32 %v4393_v33, %v4327_v1 }
  0xf3   : > { %v4587_v57 = vadd.f32 %v624_v52, %v582_v56  ;;  %1375 = vmatmul.f32.gmra.mxu3 %v4387_v31  ;;  %v1639_v56 = vsub.f32 %v4619_v39, %v4624_v44 }
  0xf4   : > { %v485_v54 = vpop.f32.mrf.mxu0  ;;  %1318 = vmatmul.f32.gmra.mxu2 %v4462_v15 }
  0xf5   : > { %1684 = vmatpush.msra.mxu2 %v1639_v56 }
  0xf6   : > { %v542_v62 = vpop.f32.mrf.mxu1  ;;  %v630_v10 = vpop.f32.mrf.mxu3 }
  0xf7   : > { %1232 = vmatmul.f32.gmra.mxu0 %v4387_v31  ;;  %v586_v63 = vpop.f32.mrf.mxu2  ;;  %v543_v7 = vadd.f32 %v542_v62, %v485_v54  ;;  %v1624_v54 = vand.u32 4294901760, %v1623_v45  ;;  %v1634_v62 = vand.u32 4294901760, %v1633_v46 }
  0xf9   : > { %v587_v14 = vadd.f32 %v586_v63, %v543_v7  ;;  %1269 = vmatmul.f32.gmra.mxu1 %v4387_v31  ;;  %v1629_v63 = vsub.f32 %v1627_v29, %v1628_v50  ;;  %v1635_v32 = vsub.f32 %v1633_v46, %v1634_v62  ;;  %v1640_v7 = vand.u32 4294901760, %v1639_v56  ;;  %2689 = vadd.xlane.f32.xlu0 %v2688_v49 }
  0xfa   : > { %1625 = vmatpush.msra.mxu1 %v1624_v54 }
  0xfb   : > { %v4599_v19 = vadd.f32 %v630_v10, %v587_v14  ;;  %1379 = vmatmul.f32.gmra.mxu3 %v4443_v59  ;;  %v1630_v10 = vand.u32 4294901760, %v1629_v63  ;;  %v391_v14 = vld [vmem:[%s4317_s20 + $0xe8] sm:$0xff]  ;;  %v1641_v23 = vsub.f32 %v1639_v56, %v1640_v7 }
  0xfc   : > { %v493_v12 = vpop.f32.mrf.mxu0  ;;  %1326 = vmatmul.f32.gmra.mxu2 %v4478_v5  ;;  %v383_v63 = vld [vmem:[%s4317_s20 + $0xa8] sm:$0xff] }
  0xfd   : > { %5454 = vst [vmem:[#allocation21_spill] sm:$0xff] %v4599_v19  ;;  %1631 = vmatpush.msra.mxu1 %v1630_v10  ;;  %v1642_v45 = vand.u32 4294901760, %v1641_v23  ;;  %v4683_v1 = vand.u32 4294901760, %v383_v63  ;;  %v2682_v10 = vadd.f32 %v4547_v60, %v4514_v24  ;;  %v4701_v23 = vld [vmem:[%s4317_s20 + $0xb8] sm:$0xff]  ;;  %v375_v24 = vld [vmem:[%s4317_s20 + $0x68] sm:$0xff] }
  0xfe   : > { %v546_v37 = vpop.f32.mrf.mxu1  ;;  %v636_v43 = vpop.f32.mrf.mxu3  ;;  %v4715_v60 = vand.u32 4294901760, %v375_v24 }
  0xff   : > { %1236 = vmatmul.f32.gmra.mxu0 %v4443_v59  ;;  %v591_v38 = vpop.f32.mrf.mxu2  ;;  %v547_v41 = vadd.f32 %v546_v37, %v493_v12  ;;  %v1636_v12 = vand.u32 4294901760, %v1635_v32 }
 0x101   : > { %v592_v51 = vadd.f32 %v591_v38, %v547_v41  ;;  %1273 = vmatmul.f32.gmra.mxu1 %v4443_v59  ;;  %v2700_v38 = vadd.f32 %v391_v14, %v390_v11  ;;  %v4656_v11 = vand.u32 4294901760, %v391_v14 }
 0x102   : > { %1637 = vmatpush.msra.mxu1 %v1636_v12  ;;  %v4698_v12 = vld [vmem:[%s4317_s20 + $0xb0] sm:$0xff] }
 0x103   : > { %v4637_v0 = vadd.f32 %v636_v43, %v592_v51  ;;  %1539 = vmatmul.f32.vlgmr.msrb.gmra.mxu3 %v4359_v16  ;;  %v2685_v43 = vadd.f32 %v4541_v55, %v4506_v20  ;;  %2701 = vadd.xlane.f32.xlu1 %v2700_v38  ;;  %v4668_v55 = vld [vmem:[%s4317_s20 + $0xf0] sm:$0xff]  ;;  %v1899_v33 = vsub.f32 %v391_v14, %v4656_v11 }
 0x104   : > { %v4631_v52 = vpop.f32.mrf.mxu0  ;;  %1502 = vmatmul.f32.vlgmr.msrb.gmra.mxu2 %v4359_v16  ;;  %1643 = vmatpush.msra.mxu1 %v1642_v45  ;;  %v4720_v38 = vsub.f32 %v375_v24, %v4715_v60 }
 0x105   : > { %5455 = vst [vmem:[#allocation22_spill] sm:$0xff] %v4637_v0  ;;  %2686 = vadd.xlane.f32.xlu2 %v2685_v43  ;;  %1846 = vmatpush.msrb.mxu2 %v4656_v11 }
 0x106   : > { %v4644_v37 = vpop.f32.mrf.mxu1  ;;  %v812_v41 = vpop.f32.mrf.mxu3 }
 0x107   : > { %1409 = vmatmul.f32.vlgmr.msrb.gmra.mxu0 %v4370_v21  ;;  %v747_v29 = vpop.f32.mrf.mxu2  ;;  %1848 = vmatpush.msrb.mxu2 %v4683_v1 }
 0x108   : > { %1766 = vmatpush.msrb.mxu0 %v1622_v36  ;;  %v4649_v46 = vadd.f32 %v812_v41, %v747_v29  ;;  %v4671_v36 = vld [vmem:[%s4317_s20 + $0xf8] sm:$0xff] }
 0x109   : > { %1451 = vmatmul.f32.vlgmr.msrb.gmra.mxu1 %v4380_v27  ;;  %v2712_v56 = vadd.f32 %v4671_v36, %v4668_v55  ;;  %1850 = vmatpush.msrb.mxu2 %v4715_v60 }
 0x10a   : > { %1770 = vmatpush.msrb.mxu0 %v1628_v50  ;;  %1809 = vmatpush.msrb.mxu1 %v4594_v3  ;;  %v2697_v3 = vadd.f32 %v383_v63, %v4597_v4 }
 0x10b   : > { %1543 = vmatmul.f32.gmra.mxu3 %v4365_v18  ;;  %2674 = vadd.xlane.f32.xlu1 %v2673_v53  ;;  %v2694_v53 = vadd.f32 %v375_v24, %v4609_v26 }
 0x10c   : > { %v4653_v51 = vpop.f32.mrf.mxu0  ;;  %1506 = vmatmul.f32.gmra.mxu2 %v4365_v18  ;;  %1774 = vmatpush.msrb.mxu0 %v1634_v62  ;;  %v2670_v62 = vadd.f32 %v4396_v34, %v4330_v2  ;;  %v1900_v2 = vand.u32 4294901760, %v1899_v33  ;;  %v1905_v34 = vsub.f32 %v383_v63, %v4683_v1 }
 0x10d   : > { %1811 = vmatpush.msrb.mxu1 %v4604_v22  ;;  %2713 = vadd.xlane.f32.xlu2 %v2712_v56  ;;  %v2667_v56 = vadd.f32 %v4404_v40, %v4342_v6 }
 0x10e   : > { %v4663_v9 = vpop.f32.mrf.mxu1  ;;  %v816_v54 = vpop.f32.mrf.mxu3  ;;  %2698 = vadd.xlane.f32.xlu0 %v2697_v3  ;;  %1778 = vmatpush.msrb.mxu0 %v1640_v7  ;;  %v1901_v41 = vsub.f32 %v1899_v33, %v1900_v2  ;;  %v1906_v43 = vand.u32 4294901760, %v1905_v34 }
 0x10f   : > { %1414 = vmatmul.f32.gmra.mxu0 %v4376_v25  ;;  %v755_v20 = vpop.f32.mrf.mxu2  ;;  %1813 = vmatpush.msrb.mxu1 %v4614_v28  ;;  %v2709_v28 = vadd.f32 %v4701_v23, %v4698_v12 }
 0x110   : > { %v4677_v50 = vadd.f32 %v816_v54, %v755_v20  ;;  %v1902_v63 = vand.u32 4294901760, %v1901_v41  ;;  %v1907_v3 = vsub.f32 %v1905_v34, %v1906_v43  ;;  %v4744_v41 = vld [vmem:[%s4317_s20 + $0x70] sm:$0xff] }
 0x111   : > { %1457 = vmatmul.f32.gmra.mxu1 %v4385_v30 }
 0x112   : > { %1815 = vmatpush.msrb.mxu1 %v4624_v44  ;;  %v367_v44 = vld [vmem:[%s4317_s20 + $0x28] sm:$0xff]  ;;  %v1908_v6 = vand.u32 4294901760, %v1907_v3  ;;  %1903 = vmatpush.msrb.mxu3 %v1902_v63 }
 0x113   : > { %1547 = vmatmul.f32.gmra.mxu3 %v4387_v31  ;;  %2671 = vadd.xlane.f32.xlu1 %v2670_v62  ;;  %v4723_v45 = vand.u32 4294901760, %v367_v44  ;;  %v2679_v62 = vadd.f32 %v4555_v8, %v4519_v35 }
 0x114   : > { %v4680_v32 = vpop.f32.mrf.mxu0  ;;  %1510 = vmatmul.f32.gmra.mxu2 %v4387_v31  ;;  %1909 = vmatpush.msrb.mxu3 %v1908_v6  ;;  %v2691_v6 = vadd.f32 %v367_v44, %v4619_v39 }
 0x115   : > { %5456 = vst [vmem:[#allocation23_spill] sm:$0xff] %v4680_v32  ;;  %2683 = vadd.xlane.f32.xlu2 %v2682_v10  ;;  %1852 = vmatpush.msrb.mxu2 %v4723_v45  ;;  %v1917_v10 = vsub.f32 %v367_v44, %v4723_v45 }
 0x116   : > { %v4691_v4 = vpop.f32.mrf.mxu1  ;;  %v820_v7 = vpop.f32.mrf.mxu3  ;;  %2710 = vadd.xlane.f32.xlu0 %v2709_v28 }
 0x117   : > { %1419 = vmatmul.f32.gmra.mxu0 %v4424_v47  ;;  %5457 = vst [vmem:[#allocation24_spill] sm:$0xff] %v4691_v4  ;;  %v763_v22 = vpop.f32.mrf.mxu2  ;;  %v1918_v28 = vand.u32 4294901760, %v1917_v10 }
 0x118   : > { %v4704_v14 = vadd.f32 %v820_v7, %v763_v22  ;;  %v1912_v7 = vand.u32 4294901760, %v4720_v38 }
 0x119   : > { %1463 = vmatmul.f32.gmra.mxu1 %v4441_v58  ;;  %v1919_v8 = vsub.f32 %v1917_v10, %v1918_v28 }
 0x11a   : > { %v1913_v40 = vsub.f32 %v4720_v38, %v1912_v7 }
 0x11b   : > { %1551 = vmatmul.f32.gmra.mxu3 %v4443_v59  ;;  %2695 = vadd.xlane.f32.xlu1 %v2694_v53 }
 0x11c   : > { %v4708_v29 = vpop.f32.mrf.mxu0  ;;  %1514 = vmatmul.f32.gmra.mxu2 %v4443_v59  ;;  %v1914_v35 = vand.u32 4294901760, %v1913_v40  ;;  %v4753_v40 = vld [vmem:[%s4317_s20 + $0x30] sm:$0xff] }
 0x11d   : > { %5458 = vst [vmem:[#allocation25_spill] sm:$0xff] %v4708_v29  ;;  %2668 = vadd.xlane.f32.xlu2 %v2667_v56  ;;  %v1920_v56 = vand.u32 4294901760, %v1919_v8 }
 0x11e   : > { %v4725_v49 = vpop.f32.mrf.mxu1  ;;  %v824_v54 = vpop.f32.mrf.mxu3  ;;  %2680 = vadd.xlane.f32.xlu0 %v2679_v62  ;;  %1915 = vmatpush.msrb.mxu3 %v1914_v35 }
 0x11f   : > { %1424 = vmatmul.f32.gmra.mxu0 %v4457_v13  ;;  %5459 = vst [vmem:[#allocation26_spill] sm:$0xff] %v4725_v49  ;;  %v771_v20 = vpop.f32.mrf.mxu2 }
 0x120   : > { %v4731_v22 = vadd.f32 %v824_v54, %v771_v20  ;;  %v4747_v20 = vld [vmem:[%s4317_s20 + $0x78] sm:$0xff]  ;;  %1921 = vmatpush.msrb.mxu3 %v1920_v56 }
 0x121   : > { %1469 = vmatmul.f32.gmra.mxu1 %v4465_v17  ;;  %v2706_v63 = vadd.f32 %v4747_v20, %v4744_v41 }
 0x123   : > { %1729 = vmatmul.f32.vlgmr.msra.gmra.mxu3 %v4380_v27  ;;  %2707 = vadd.xlane.f32.xlu1 %v2706_v63 }
 0x124   : > { %v854_v26 = vpop.f32.mrf.mxu0  ;;  %1687 = vmatmul.f32.vlgmr.msra.gmra.mxu2 %v4370_v21  ;;  %2087 = vmatpush.msra.mxu3 %v4656_v11 }
 0x125   : > { %v855_v24 = vadd.f32 %v854_v26, %v4649_v46  ;;  %2044 = vmatpush.msra.mxu2 %v1900_v2  ;;  %v4756_v46 = vld [vmem:[%s4317_s20 + $0x38] sm:$0xff]  ;;  %2692 = vadd.xlane.f32.xlu2 %v2691_v6 }
 0x126   : > { %v896_v53 = vpop.f32.mrf.mxu1  ;;  %v984_v62 = vpop.f32.mrf.mxu3  ;;  %2089 = vmatpush.msra.mxu3 %v4683_v1 }
 0x127   : > { %1580 = vmatmul.f32.vlgmr.msra.gmra.mxu0 %v4407_v42  ;;  %v947_v54 = vpop.f32.mrf.mxu2  ;;  %v897_v3 = vadd.f32 %v896_v53, %v855_v24  ;;  %2048 = vmatpush.msra.mxu2 %v1906_v43 }
 0x128   : > { %1953 = vmatpush.msra.mxu0 %v1899_v33  ;;  %v2703_v33 = vadd.f32 %v4756_v46, %v4753_v40  ;;  %2091 = vmatpush.msra.mxu3 %v4715_v60 }
 0x129   : > { %v948_v26 = vadd.f32 %v947_v54, %v897_v3  ;;  %1645 = vmatmul.f32.vlgmr.msra.gmra.mxu1 %v4359_v16  ;;  %2052 = vmatpush.msra.mxu2 %v1912_v7 }
 0x12a   : > { %1956 = vmatpush.msra.mxu0 %v1905_v34  ;;  %2704 = vadd.xlane.f32.xlu0 %v2703_v33 }
 0x12b   : > { %v4762_v39 = vadd.f32 %v984_v62, %v948_v26  ;;  %1735 = vmatmul.f32.gmra.mxu3 %v4385_v30  ;;  %1997 = vmatpush.msra.mxu1 %v4656_v11 }
 0x12c   : > { %v859_v2 = vpop.f32.mrf.mxu0  ;;  %1959 = vmatpush.msra.mxu0 %v4720_v38  ;;  %1692 = vmatmul.f32.gmra.mxu2 %v4376_v25 }
 0x12d   : > { %5460 = vst [vmem:[#allocation27_spill] sm:$0xff] %v4762_v39  ;;  %v860_v34 = vadd.f32 %v859_v2, %v4677_v50  ;;  %1999 = vmatpush.msra.mxu1 %v4683_v1  ;;  %2056 = vmatpush.msra.mxu2 %v1918_v28 }
 0x12e   : > { %1962 = vmatpush.msra.mxu0 %v1917_v10  ;;  %v902_v44 = vpop.f32.mrf.mxu1  ;;  %v988_v35 = vpop.f32.mrf.mxu3  ;;  %2093 = vmatpush.msra.mxu3 %v4723_v45 }
 0x12f   : > { %1588 = vmatmul.f32.gmra.mxu0 %v4446_v61  ;;  %v951_v43 = vpop.f32.mrf.mxu2  ;;  %v903_v38 = vadd.f32 %v902_v44, %v860_v34  ;;  %2001 = vmatpush.msra.mxu1 %v4715_v60 }
 0x131   : > { %v952_v24 = vadd.f32 %v951_v43, %v903_v38  ;;  %1649 = vmatmul.f32.gmra.mxu1 %v4365_v18  ;;  %v4810_v43 = vand.u32 4294901760, %v4744_v41 }
 0x132   : > { %2003 = vmatpush.msra.mxu1 %v4723_v45 }
 0x133   : > { %v4776_v11 = vadd.f32 %v988_v35, %v952_v24  ;;  %1741 = vmatmul.f32.gmra.mxu3 %v4441_v58  ;;  %v4817_v24 = vand.u32 4294901760, %v4753_v40 }
 0x134   : > { %v864_v8 = vpop.f32.mrf.mxu0  ;;  %1697 = vmatmul.f32.gmra.mxu2 %v4424_v47 }
 0x135   : > { %v865_v50 = vadd.f32 %v864_v8, %v4704_v14  ;;  %v4791_v14 = vand.u32 4294901760, %v4668_v55 }
 0x136   : > { %v908_v1 = vpop.f32.mrf.mxu1  ;;  %v992_v28 = vpop.f32.mrf.mxu3 }
 0x137   : > { %1596 = vmatmul.f32.gmra.mxu0 %v4462_v15  ;;  %v955_v7 = vpop.f32.mrf.mxu2  ;;  %v909_v10 = vadd.f32 %v908_v1, %v865_v50  ;;  %v4796_v2 = vsub.f32 %v4668_v55, %v4791_v14 }
 0x139   : > { %v956_v60 = vadd.f32 %v955_v7, %v909_v10  ;;  %1653 = vmatmul.f32.gmra.mxu1 %v4387_v31 }
 0x13b   : > { %v4784_v54 = vadd.f32 %v992_v28, %v956_v60  ;;  %1747 = vmatmul.f32.gmra.mxu3 %v4465_v17 }
 0x13c   : > { %v869_v53 = vpop.f32.mrf.mxu0  ;;  %1702 = vmatmul.f32.gmra.mxu2 %v4457_v13 }
 0x13d   : > { %5461 = vst [vmem:[#allocation28_spill] sm:$0xff] %v4784_v54  ;;  %v870_v45 = vadd.f32 %v869_v53, %v4731_v22  ;;  %v4805_v22 = vand.u32 4294901760, %v4698_v12 }
 0x13e   : > { %v914_v56 = vpop.f32.mrf.mxu1  ;;  %v996_v62 = vpop.f32.mrf.mxu3 }
 0x13f   : > { %1604 = vmatmul.f32.gmra.mxu0 %v4478_v5  ;;  %v959_v63 = vpop.f32.mrf.mxu2  ;;  %v915_v3 = vadd.f32 %v914_v56, %v870_v45 }
 0x141   : > { %v960_v6 = vadd.f32 %v959_v63, %v915_v3  ;;  %1657 = vmatmul.f32.gmra.mxu1 %v4443_v59 }
 0x143   : > { %v4798_v26 = vadd.f32 %v996_v62, %v960_v6  ;;  %1923 = vmatmul.f32.vlgmr.msrb.gmra.mxu3 %v4359_v16 }
 0x144   : > { %v1025_v33 = vpop.f32.mrf.mxu0  ;;  %1858 = vmatmul.f32.vlgmr.msrb.gmra.mxu2 %v4407_v42  ;;  %2275 = vmatpush.msrb.mxu3 %v4791_v14 }
 0x145   : > { %5462 = vst [vmem:[#allocation29_spill] sm:$0xff] %v4798_v26  ;;  %2231 = vmatpush.msrb.mxu2 %v4796_v2 }
 0x146   : > { %v1090_v34 = vpop.f32.mrf.mxu1  ;;  %v1174_v38 = vpop.f32.mrf.mxu3  ;;  %2277 = vmatpush.msrb.mxu3 %v4805_v22 }
 0x147   : > { %1780 = vmatmul.f32.vlgmr.msrb.gmra.mxu0 %v4359_v16  ;;  %v1132_v55 = vpop.f32.mrf.mxu2  ;;  %v1091_v44 = vadd.f32 %v1090_v34, %v1025_v33 }
 0x148   : > { %2124 = vmatpush.msrb.mxu0 %v4791_v14  ;;  %2279 = vmatpush.msrb.mxu3 %v4810_v43 }
 0x149   : > { %v1133_v8 = vadd.f32 %v1132_v55, %v1091_v44  ;;  %1817 = vmatmul.f32.vlgmr.msrb.gmra.mxu1 %v4359_v16  ;;  %v2183_v55 = vsub.f32 %v4698_v12, %v4805_v22  ;;  %v2178_v44 = vand.u32 4294901760, %v4796_v2 }
 0x14a   : > { %2126 = vmatpush.msrb.mxu0 %v4805_v22  ;;  %2281 = vmatpush.msrb.mxu3 %v4817_v24 }
 0x14b   : > { %v4820_v50 = vadd.f32 %v1174_v38, %v1133_v8  ;;  %1927 = vmatmul.f32.gmra.mxu3 %v4365_v18  ;;  %2234 = vmatpush.msrb.mxu2 %v2183_v55 }
 0x14c   : > { %v1033_v35 = vpop.f32.mrf.mxu0  ;;  %2128 = vmatpush.msrb.mxu0 %v4810_v43  ;;  %1866 = vmatmul.f32.gmra.mxu2 %v4446_v61 }
 0x14e   : > { %2130 = vmatpush.msrb.mxu0 %v4817_v24  ;;  %v1094_v1 = vpop.f32.mrf.mxu1  ;;  %v1180_v28 = vpop.f32.mrf.mxu3 }
 0x14f   : > { %1784 = vmatmul.f32.gmra.mxu0 %v4365_v18  ;;  %v1137_v7 = vpop.f32.mrf.mxu2  ;;  %v1095_v10 = vadd.f32 %v1094_v1, %v1033_v35 }
 0x151   : > { %v1138_v60 = vadd.f32 %v1137_v7, %v1095_v10  ;;  %1821 = vmatmul.f32.gmra.mxu1 %v4365_v18  ;;  %v2179_v7 = vsub.f32 %v4796_v2, %v2178_v44  ;;  %v2189_v10 = vsub.f32 %v4744_v41, %v4810_v43 }
 0x153   : > { %v4828_v45 = vadd.f32 %v1180_v28, %v1138_v60  ;;  %1931 = vmatmul.f32.gmra.mxu3 %v4387_v31  ;;  %v2184_v28 = vand.u32 4294901760, %v2183_v55  ;;  %2237 = vmatpush.msrb.mxu2 %v2189_v10 }
 0x154   : > { %v1041_v53 = vpop.f32.mrf.mxu0  ;;  %1874 = vmatmul.f32.gmra.mxu2 %v4462_v15 }
 0x155   : > { %v2185_v12 = vsub.f32 %v2183_v55, %v2184_v28 }
 0x156   : > { %v1098_v56 = vpop.f32.mrf.mxu1  ;;  %v1186_v62 = vpop.f32.mrf.mxu3 }
 0x157   : > { %1788 = vmatmul.f32.gmra.mxu0 %v4387_v31  ;;  %v1142_v63 = vpop.f32.mrf.mxu2  ;;  %v1099_v3 = vadd.f32 %v1098_v56, %v1041_v53  ;;  %v2180_v56 = vand.u32 4294901760, %v2179_v7  ;;  %v2186_v41 = vand.u32 4294901760, %v2185_v12 }
 0x159   : > { %v1143_v33 = vadd.f32 %v1142_v63, %v1099_v3  ;;  %1825 = vmatmul.f32.gmra.mxu1 %v4387_v31  ;;  %v2195_v63 = vsub.f32 %v4753_v40, %v4817_v24  ;;  %v2190_v3 = vand.u32 4294901760, %v2189_v10  ;;  %v4859_v40 = vand.u32 4294901760, %v4701_v23 }
 0x15a   : > { %2181 = vmatpush.msrb.mxu1 %v2180_v56  ;;  %v4875_v56 = vand.u32 4294901760, %v4756_v46 }
 0x15b   : > { %v4834_v34 = vadd.f32 %v1186_v62, %v1143_v33  ;;  %1935 = vmatmul.f32.gmra.mxu3 %v4443_v59  ;;  %v2196_v2 = vand.u32 4294901760, %v2195_v63  ;;  %v2191_v33 = vsub.f32 %v2189_v10, %v2190_v3  ;;  %2240 = vmatpush.msrb.mxu2 %v2195_v63 }
 0x15c   : > { %v1049_v6 = vpop.f32.mrf.mxu0  ;;  %1882 = vmatmul.f32.gmra.mxu2 %v4478_v5  ;;  %2187 = vmatpush.msrb.mxu1 %v2186_v41 }
 0x15d   : > { %5463 = vst [vmem:[#allocation30_spill] sm:$0xff] %v4834_v34  ;;  %v2197_v55 = vsub.f32 %v2195_v63, %v2196_v2 }
 0x15e   : > { %v1102_v38 = vpop.f32.mrf.mxu1  ;;  %v1192_v1 = vpop.f32.mrf.mxu3 }
 0x15f   : > { %1792 = vmatmul.f32.gmra.mxu0 %v4443_v59  ;;  %v1147_v35 = vpop.f32.mrf.mxu2  ;;  %v1103_v8 = vadd.f32 %v1102_v38, %v1049_v6  ;;  %v4855_v6 = vand.u32 4294901760, %v4671_v36  ;;  %v2198_v7 = vand.u32 4294901760, %v2197_v55 }
 0x161   : > { %v1148_v53 = vadd.f32 %v1147_v35, %v1103_v8  ;;  %1829 = vmatmul.f32.gmra.mxu1 %v4443_v59  ;;  %v2192_v8 = vand.u32 4294901760, %v2191_v33 }
 0x163   : > { %v4850_v62 = vadd.f32 %v1192_v1, %v1148_v53  ;;  %2095 = vmatmul.f32.vlgmr.msra.gmra.mxu3 %v4359_v16  ;;  %v4865_v53 = vand.u32 4294901760, %v4747_v20  ;;  %2193 = vmatpush.msrb.mxu1 %v2192_v8 }
 0x164   : > { %v4845_v60 = vpop.f32.mrf.mxu0  ;;  %2058 = vmatmul.f32.vlgmr.msra.gmra.mxu2 %v4359_v16 }
 0x165   : > { %5464 = vst [vmem:[#allocation31_spill] sm:$0xff] %v4850_v62  ;;  %2402 = vmatpush.msra.mxu2 %v4855_v6  ;;  %2199 = vmatpush.msrb.mxu1 %v2198_v7  ;;  %v4910_v8 = vsub.f32 %v4747_v20, %v4865_v53 }
 0x166   : > { %v4861_v38 = vpop.f32.mrf.mxu1  ;;  %v1368_v1 = vpop.f32.mrf.mxu3 }
 0x167   : > { %1965 = vmatmul.f32.vlgmr.msra.gmra.mxu0 %v4370_v21  ;;  %v1303_v35 = vpop.f32.mrf.mxu2  ;;  %2404 = vmatpush.msra.mxu2 %v4859_v40 }
 0x168   : > { %2322 = vmatpush.msra.mxu0 %v2178_v44  ;;  %v4867_v10 = vadd.f32 %v1368_v1, %v1303_v35 }
 0x169   : > { %2007 = vmatmul.f32.vlgmr.msra.gmra.mxu1 %v4380_v27  ;;  %2406 = vmatpush.msra.mxu2 %v4865_v53 }
 0x16a   : > { %2326 = vmatpush.msra.mxu0 %v2184_v28  ;;  %2365 = vmatpush.msra.mxu1 %v4791_v14  ;;  %v4895_v14 = vpop.xlane.xlu0 %2677 }
 0x16b   : > { %2099 = vmatmul.f32.gmra.mxu3 %v4365_v18  ;;  %2408 = vmatpush.msra.mxu2 %v4875_v56 }
 0x16c   : > { %v4870_v44 = vpop.f32.mrf.mxu0  ;;  %2330 = vmatpush.msra.mxu0 %v2190_v3  ;;  %2062 = vmatmul.f32.gmra.mxu2 %v4365_v18 }
 0x16d   : > { %2367 = vmatpush.msra.mxu1 %v4805_v22 }
 0x16e   : > { %2334 = vmatpush.msra.mxu0 %v2196_v2  ;;  %v4882_v28 = vpop.f32.mrf.mxu1  ;;  %v1372_v63 = vpop.f32.mrf.mxu3 }
 0x16f   : > { %1970 = vmatmul.f32.gmra.mxu0 %v4376_v25  ;;  %v1311_v12 = vpop.f32.mrf.mxu2  ;;  %2369 = vmatpush.msra.mxu1 %v4810_v43  ;;  %v2455_v43 = vsub.f32 %v4671_v36, %v4855_v6 }
 0x170   : > { %v4885_v3 = vadd.f32 %v1372_v63, %v1311_v12 }
 0x171   : > { %2013 = vmatmul.f32.gmra.mxu1 %v4385_v30  ;;  %v2456_v36 = vand.u32 4294901760, %v2455_v43 }
 0x172   : > { %2371 = vmatpush.msra.mxu1 %v4817_v24  ;;  %v2461_v24 = vsub.f32 %v4701_v23, %v4859_v40  ;;  %v4921_v23 = vsub.f32 %v4756_v46, %v4875_v56  ;;  %v2690_v12 = vpop.xlane.xlu0 %2689 }
 0x173   : > { %2103 = vmatmul.f32.gmra.mxu3 %v4387_v31  ;;  %v2457_v63 = vsub.f32 %v2455_v43, %v2456_v36 }
 0x174   : > { %v4888_v41 = vpop.f32.mrf.mxu0  ;;  %2066 = vmatmul.f32.gmra.mxu2 %v4387_v31  ;;  %v2474_v19 = vand.u32 4294901760, %v4921_v23 }
 0x175   : > { %5465 = vst [vmem:[#allocation32_spill] sm:$0xff] %v4888_v41  ;;  %v2468_v41 = vand.u32 4294901760, %v4910_v8 }
 0x176   : > { %v4897_v22 = vpop.f32.mrf.mxu1  ;;  %v1376_v33 = vpop.f32.mrf.mxu3  ;;  %v2475_v49 = vsub.f32 %v4921_v23, %v2474_v19 }
 0x177   : > { %1975 = vmatmul.f32.gmra.mxu0 %v4424_v47  ;;  %5466 = vst [vmem:[#allocation33_spill] sm:$0xff] %v4897_v22  ;;  %v1319_v2 = vpop.f32.mrf.mxu2  ;;  %v4914_v1 = vpop.xlane.xlu1 %2701  ;;  %v2458_v22 = vand.u32 4294901760, %v2457_v63  ;;  %v2469_v46 = vsub.f32 %v4910_v8, %v2468_v41 }
 0x178   : > { %v4901_v55 = vadd.f32 %v1376_v33, %v1319_v2  ;;  %v4917_v7 = vpop.xlane.xlu2 %2686  ;;  %v2462_v2 = vand.u32 4294901760, %v2461_v24 }
 0x179   : > { %2019 = vmatmul.f32.gmra.mxu1 %v4441_v58  ;;  %2459 = vmatpush.msra.mxu3 %v2458_v22  ;;  %v2470_v63 = vand.u32 4294901760, %v2469_v46 }
 0x17a   : > { %v2463_v26 = vsub.f32 %v2461_v24, %v2462_v2 }
 0x17b   : > { %2107 = vmatmul.f32.gmra.mxu3 %v4443_v59 }
 0x17c   : > { %v4905_v35 = vpop.f32.mrf.mxu0  ;;  %2070 = vmatmul.f32.gmra.mxu2 %v4443_v59  ;;  %v2464_v32 = vand.u32 4294901760, %v2463_v26  ;;  %v2476_v26 = vand.u32 4294901760, %v2475_v49 }
 0x17d   : > { %5467 = vst [vmem:[#allocation34_spill] sm:$0xff] %v4905_v35 }
 0x17e   : > { %v4923_v20 = vpop.f32.mrf.mxu1  ;;  %v1380_v54 = vpop.f32.mrf.mxu3  ;;  %2465 = vmatpush.msra.mxu3 %v2464_v32 }
 0x17f   : > { %1980 = vmatmul.f32.gmra.mxu0 %v4457_v13  ;;  %5468 = vst [vmem:[#allocation35_spill] sm:$0xff] %v4923_v20  ;;  %v1327_v33 = vpop.f32.mrf.mxu2  ;;  %v2675_v20 = vpop.xlane.xlu1 %2674 }
 0x180   : > { %v4926_v34 = vadd.f32 %v1380_v54, %v1327_v33  ;;  %v2714_v54 = vpop.xlane.xlu2 %2713  ;;  %2471 = vmatpush.msra.mxu3 %v2470_v63 }
 0x181   : > { %2025 = vmatmul.f32.gmra.mxu1 %v4465_v17  ;;  %v2699_v22 = vpop.xlane.xlu0 %2698 }
 0x182   : > { %2477 = vmatpush.msra.mxu3 %v2476_v26 }
 0x183   : > { %2285 = vmatmul.f32.vlgmr.msrb.gmra.mxu3 %v4380_v27 }
 0x184   : > { %v1410_v4 = vpop.f32.mrf.mxu0  ;;  %2243 = vmatmul.f32.vlgmr.msrb.gmra.mxu2 %v4370_v21  ;;  %2643 = vmatpush.msrb.mxu3 %v4855_v6 }
 0x185   : > { %v1411_v33 = vadd.f32 %v1410_v4, %v4867_v10  ;;  %2600 = vmatpush.msrb.mxu2 %v2456_v36 }
 0x186   : > { %v1452_v35 = vpop.f32.mrf.mxu1  ;;  %v1540_v0 = vpop.f32.mrf.mxu3  ;;  %2645 = vmatpush.msrb.mxu3 %v4859_v40 }
 0x187   : > { %2136 = vmatmul.f32.vlgmr.msrb.gmra.mxu0 %v4407_v42  ;;  %v1503_v62 = vpop.f32.mrf.mxu2  ;;  %v1453_v29 = vadd.f32 %v1452_v35, %v1411_v33  ;;  %2604 = vmatpush.msrb.mxu2 %v2462_v2  ;;  %v2672_v4 = vpop.xlane.xlu1 %2671 }
 0x188   : > { %2509 = vmatpush.msrb.mxu0 %v2455_v43  ;;  %v2684_v49 = vpop.xlane.xlu2 %2683  ;;  %2647 = vmatpush.msrb.mxu3 %v4865_v53 }
 0x189   : > { %v1504_v39 = vadd.f32 %v1503_v62, %v1453_v29  ;;  %2201 = vmatmul.f32.vlgmr.msrb.gmra.mxu1 %v4359_v16  ;;  %v2719_v62 = vsel %vm2715_vm1, %v4895_v14, %v2690_v12  ;;  %v2711_v10 = vpop.xlane.xlu0 %2710  ;;  %2608 = vmatpush.msrb.mxu2 %v2468_v41  ;;  %v2717_v2 = vsel %vm2715_vm1, %v2672_v4, %v2684_v49 }
 0x18a   : > { %2512 = vmatpush.msrb.mxu0 %v2461_v24  ;;  %2553 = vmatpush.msrb.mxu1 %v4855_v6  ;;  %v2718_v24 = vsel %vm2715_vm1, %v2675_v20, %v4917_v7 }
 0x18b   : > { %v4940_v32 = vadd.f32 %v1540_v0, %v1504_v39  ;;  %2291 = vmatmul.f32.gmra.mxu3 %v4385_v30  ;;  %2612 = vmatpush.msrb.mxu2 %v2474_v19 }
 0x18c   : > { %v1415_v46 = vpop.f32.mrf.mxu0  ;;  %2515 = vmatpush.msrb.mxu0 %v4910_v8  ;;  %2248 = vmatmul.f32.gmra.mxu2 %v4376_v25 }
 0x18d   : > { %v1416_v29 = vadd.f32 %v1415_v46, %v4885_v3  ;;  %2555 = vmatpush.msrb.mxu1 %v4859_v40  ;;  %v2724_v3 = vsel %vm2720_vm2, %v2719_v62, %v4914_v1  ;;  %2649 = vmatpush.msrb.mxu3 %v4875_v56  ;;  %v2723_v40 = vsel %vm2720_vm2, %v2718_v24, %v2699_v22 }
 0x18e   : > { %2518 = vmatpush.msrb.mxu0 %v4921_v23  ;;  %v1458_v0 = vpop.f32.mrf.mxu1  ;;  %v1544_v43 = vpop.f32.mrf.mxu3  ;;  %v2729_v19 = vsel %vm2725_vm3, %v2724_v3, %v2714_v54  ;;  %v2728_v36 = vsel %vm2725_vm3, %v2723_v40, %v2711_v10 }
 0x18f   : > { %2144 = vmatmul.f32.gmra.mxu0 %v4446_v61  ;;  %v1507_v39 = vpop.f32.mrf.mxu2  ;;  %v1459_v6 = vadd.f32 %v1458_v0, %v1416_v29  ;;  %2557 = vmatpush.msrb.mxu1 %v4865_v53  ;;  %v2696_v8 = vpop.xlane.xlu1 %2695  ;;  %v4972_v33 = vand.u32 4294901760, %v2728_v36 }
 0x190   : > { %v2669_v53 = vpop.xlane.xlu2 %2668  ;;  %v2722_v26 = vsel %vm2720_vm2, %v2717_v2, %v2696_v8 }
 0x191   : > { %v1508_v14 = vadd.f32 %v1507_v39, %v1459_v6  ;;  %2205 = vmatmul.f32.gmra.mxu1 %v4365_v18  ;;  %v2681_v7 = vpop.xlane.xlu0 %2680  ;;  %v4986_v49 = vsub.f32 %v2728_v36, %v4972_v33 }
 0x192   : > { %2559 = vmatpush.msrb.mxu1 %v4875_v56  ;;  %v4969_v56 = vand.u32 4294901760, %v2729_v19  ;;  %v2716_v46 = vsel %vm2715_vm1, %v2669_v53, %v2681_v7 }
 0x193   : > { %v4961_v35 = vadd.f32 %v1544_v43, %v1508_v14  ;;  %2297 = vmatmul.f32.gmra.mxu3 %v4441_v58 }
 0x194   : > { %v1420_v41 = vpop.f32.mrf.mxu0  ;;  %2253 = vmatmul.f32.gmra.mxu2 %v4424_v47 }
 0x195   : > { %v1421_v1 = vadd.f32 %v1420_v41, %v4901_v55  ;;  %v4977_v55 = vsub.f32 %v2729_v19, %v4969_v56 }
 0x196   : > { %v1464_v23 = vpop.f32.mrf.mxu1  ;;  %v1548_v63 = vpop.f32.mrf.mxu3 }
 0x197   : > { %2152 = vmatmul.f32.gmra.mxu0 %v4462_v15  ;;  %v1511_v12 = vpop.f32.mrf.mxu2  ;;  %v1465_v20 = vadd.f32 %v1464_v23, %v1421_v1  ;;  %v2708_v4 = vpop.xlane.xlu1 %2707  ;;  %v2813_v41 = vand.u32 4294901760, %v4977_v55 }
 0x198   : > { %v2727_v62 = vsel %vm2725_vm3, %v2722_v26, %v2708_v4  ;;  %v2693_v10 = vpop.xlane.xlu2 %2692 }
 0x199   : > { %v1512_v22 = vadd.f32 %v1511_v12, %v1465_v20  ;;  %2209 = vmatmul.f32.gmra.mxu1 %v4387_v31  ;;  %v4990_v39 = vand.u32 4294901760, %v2727_v62  ;;  %v2721_v6 = vsel %vm2720_vm2, %v2716_v46, %v2693_v10  ;;  %v2814_v23 = vsub.f32 %v4977_v55, %v2813_v41 }
 0x19b   : > { %v4980_v29 = vadd.f32 %v1548_v63, %v1512_v22  ;;  %2303 = vmatmul.f32.gmra.mxu3 %v4465_v17  ;;  %v4996_v8 = vsub.f32 %v2727_v62, %v4990_v39  ;;  %v2815_v26 = vand.u32 4294901760, %v2814_v23 }
 0x19c   : > { %v1425_v54 = vpop.f32.mrf.mxu0  ;;  %2258 = vmatmul.f32.gmra.mxu2 %v4457_v13 }
 0x19d   : > { %5469 = vst [vmem:[#allocation36_spill] sm:$0xff] %v4980_v29  ;;  %v1426_v0 = vadd.f32 %v1425_v54, %v4926_v34  ;;  %v2705_v43 = vpop.xlane.xlu0 %2704  ;;  %v2819_v34 = vand.u32 4294901760, %v4986_v49  ;;  %v2825_v12 = vand.u32 4294901760, %v4996_v8 }
 0x19e   : > { %v1470_v24 = vpop.f32.mrf.mxu1  ;;  %v2726_v14 = vsel %vm2725_vm3, %v2721_v6, %v2705_v43  ;;  %v1552_v19 = vpop.f32.mrf.mxu3 }
 0x19f   : > { %2160 = vmatmul.f32.gmra.mxu0 %v4478_v5  ;;  %v1515_v3 = vpop.f32.mrf.mxu2  ;;  %v1471_v40 = vadd.f32 %v1470_v24, %v1426_v0  ;;  %v4998_v53 = vand.u32 4294901760, %v2726_v14  ;;  %v2820_v20 = vsub.f32 %v4986_v49, %v2819_v34 }
 0x1a1   : > { %v1516_v1 = vadd.f32 %v1515_v3, %v1471_v40  ;;  %2213 = vmatmul.f32.gmra.mxu1 %v4443_v59  ;;  %v5003_v7 = vsub.f32 %v2726_v14, %v4998_v53  ;;  %v2821_v62 = vand.u32 4294901760, %v2820_v20 }
 0x1a3   : > { %v5009_v2 = vadd.f32 %v1552_v19, %v1516_v1  ;;  %2479 = vmatmul.f32.vlgmr.msra.gmra.mxu3 %v4359_v16  ;;  %v2831_v63 = vand.u32 4294901760, %v5003_v7 }
 0x1a4   : > { %v1581_v36 = vpop.f32.mrf.mxu0  ;;  %2414 = vmatmul.f32.vlgmr.msra.gmra.mxu2 %v4407_v42  ;;  %2910 = vmatpush.msra.mxu3 %v4969_v56  ;;  %v2826_v42 = vsub.f32 %v4996_v8, %v2825_v12 }
 0x1a5   : > { %5470 = vst [vmem:[#allocation37_spill] sm:$0xff] %v5009_v2  ;;  %2866 = vmatpush.msra.mxu2 %v4977_v55  ;;  %v2832_v10 = vsub.f32 %v5003_v7, %v2831_v63 }
 0x1a6   : > { %v1646_v54 = vpop.f32.mrf.mxu1  ;;  %v1730_v4 = vpop.f32.mrf.mxu3  ;;  %2912 = vmatpush.msra.mxu3 %v4972_v33  ;;  %v2827_v43 = vand.u32 4294901760, %v2826_v42 }
 0x1a7   : > { %2336 = vmatmul.f32.vlgmr.msra.gmra.mxu0 %v4359_v16  ;;  %v1688_v22 = vpop.f32.mrf.mxu2  ;;  %2869 = vmatpush.msra.mxu2 %v4986_v49  ;;  %v1647_v46 = vadd.f32 %v1646_v54, %v1581_v36  ;;  %v2833_v3 = vand.u32 4294901760, %v2832_v10 }
 0x1a8   : > { %2759 = vmatpush.msra.mxu0 %v4969_v56  ;;  %2914 = vmatpush.msra.mxu3 %v4990_v39 }
 0x1a9   : > { %2872 = vmatpush.msra.mxu2 %v4996_v8  ;;  %v1689_v6 = vadd.f32 %v1688_v22, %v1647_v46  ;;  %2373 = vmatmul.f32.vlgmr.msra.gmra.mxu1 %v4359_v16 }
 0x1aa   : > { %2761 = vmatpush.msra.mxu0 %v4972_v33  ;;  %2816 = vmatpush.msra.mxu1 %v2815_v26 }
 0x1ab   : > { %v5034_v24 = vadd.f32 %v1730_v4, %v1689_v6  ;;  %2483 = vmatmul.f32.gmra.mxu3 %v4365_v18  ;;  %2875 = vmatpush.msra.mxu2 %v5003_v7 }
 0x1ac   : > { %v1589_v0 = vpop.f32.mrf.mxu0  ;;  %2763 = vmatpush.msra.mxu0 %v4990_v39  ;;  %2422 = vmatmul.f32.gmra.mxu2 %v4446_v61 }
 0x1ad   : > { %2822 = vmatpush.msra.mxu1 %v2821_v62  ;;  %2916 = vmatpush.msra.mxu3 %v4998_v53 }
 0x1ae   : > { %2765 = vmatpush.msra.mxu0 %v4998_v53  ;;  %v1650_v14 = vpop.f32.mrf.mxu1  ;;  %v1736_v1 = vpop.f32.mrf.mxu3 }
 0x1af   : > { %2340 = vmatmul.f32.gmra.mxu0 %v4365_v18  ;;  %v1693_v40 = vpop.f32.mrf.mxu2  ;;  %2828 = vmatpush.msra.mxu1 %v2827_v43  ;;  %v1651_v19 = vadd.f32 %v1650_v14, %v1589_v0 }
 0x1b1   : > { %2834 = vmatpush.msra.mxu1 %v2833_v3  ;;  %v1694_v61 = vadd.f32 %v1693_v40, %v1651_v19 }
 0x1b2   : > { %2377 = vmatmul.f32.gmra.mxu1 %v4365_v18 }
 0x1b3   : > { %v5043_v23 = vadd.f32 %v1736_v1, %v1694_v61  ;;  %2487 = vmatmul.f32.gmra.mxu3 %v4387_v31 }
 0x1b4   : > { %v1597_v36 = vpop.f32.mrf.mxu0  ;;  %2430 = vmatmul.f32.gmra.mxu2 %v4462_v15 }
 0x1b6   : > { %v1654_v20 = vpop.f32.mrf.mxu1  ;;  %v1742_v26 = vpop.f32.mrf.mxu3 }
 0x1b7   : > { %2344 = vmatmul.f32.gmra.mxu0 %v4387_v31  ;;  %v1698_v54 = vpop.f32.mrf.mxu2  ;;  %v1655_v22 = vadd.f32 %v1654_v20, %v1597_v36 }
 0x1b9   : > { %v1699_v46 = vadd.f32 %v1698_v54, %v1655_v22 }
 0x1ba   : > { %2381 = vmatmul.f32.gmra.mxu1 %v4387_v31 }
 0x1bb   : > { %v5049_v4 = vadd.f32 %v1742_v26, %v1699_v46  ;;  %2491 = vmatmul.f32.gmra.mxu3 %v4443_v59 }
 0x1bc   : > { %v1605_v42 = vpop.f32.mrf.mxu0  ;;  %2438 = vmatmul.f32.gmra.mxu2 %v4478_v5 }
 0x1bd   : > { %5471 = vst [vmem:[#allocation38_spill] sm:$0xff] %v5049_v4 }
 0x1be   : > { %v1658_v15 = vpop.f32.mrf.mxu1  ;;  %v1748_v0 = vpop.f32.mrf.mxu3 }
 0x1bf   : > { %2348 = vmatmul.f32.gmra.mxu0 %v4443_v59  ;;  %v1703_v62 = vpop.f32.mrf.mxu2  ;;  %v1659_v10 = vadd.f32 %v1658_v15, %v1605_v42 }
 0x1c1   : > { %v1704_v6 = vadd.f32 %v1703_v62, %v1659_v10 }
 0x1c2   : > { %2385 = vmatmul.f32.gmra.mxu1 %v4443_v59 }
 0x1c3   : > { %v5057_v3 = vadd.f32 %v1748_v0, %v1704_v6  ;;  %2651 = vmatmul.f32.vlgmr.msrb.gmra.mxu3 %v4359_v16 }
 0x1c4   : > { %v5054_v43 = vpop.f32.mrf.mxu0  ;;  %2614 = vmatmul.f32.vlgmr.msrb.gmra.mxu2 %v4359_v16  ;;  %v2730_v16 = vld [vmem:[#allocation6] sm:$0xff] }
 0x1c5   : > { %5472 = vst [vmem:[#allocation39_spill] sm:$0xff] %v5057_v3 }
 0x1c6   : > { %v5064_v5 = vpop.f32.mrf.mxu1  ;;  %v5070_v40 = vpop.f32.mrf.mxu3 }
 0x1c7   : > { %2521 = vmatmul.f32.vlgmr.msrb.gmra.mxu0 %v4370_v21  ;;  %v5066_v14 = vpop.f32.mrf.mxu2  ;;  %v2735_v21 = vsel %vm430_vm0, %v2730_v16, 0 }
 0x1c8   : > { %2957 = vmatpush.msrb.mxu0 %v2813_v41 }
 0x1ca   : > { %2961 = vmatpush.msrb.mxu0 %v2819_v34  ;;  %2563 = vmatmul.f32.vlgmr.msrb.gmra.mxu1 %v4380_v27 }
 0x1cb   : > { %3000 = vmatpush.msrb.mxu1 %v4969_v56  ;;  %2655 = vmatmul.f32.gmra.mxu3 %v4365_v18 }
 0x1cc   : > { %v5072_v19 = vpop.f32.mrf.mxu0  ;;  %2965 = vmatpush.msrb.mxu0 %v2825_v12  ;;  %2618 = vmatmul.f32.gmra.mxu2 %v4365_v18  ;;  %v5093_v18 = vand.u32 4294901760, %v2735_v21 }
 0x1cd   : > { %3002 = vmatpush.msrb.mxu1 %v4972_v33  ;;  %v2731_v33 = vld [vmem:[#allocation6 + $0x8] sm:$0xff] }
 0x1ce   : > { %2969 = vmatpush.msrb.mxu0 %v2831_v63  ;;  %v5085_v27 = vpop.f32.mrf.mxu1  ;;  %v5090_v56 = vpop.f32.mrf.mxu3  ;;  %v2767_v49 = vsub.f32 %v2735_v21, %v5093_v18 }
 0x1cf   : > { %2526 = vmatmul.f32.gmra.mxu0 %v4376_v25  ;;  %v5087_v55 = vpop.f32.mrf.mxu2  ;;  %3004 = vmatpush.msrb.mxu1 %v4990_v39  ;;  %5474 = vst [vmem:[#allocation41_spill] sm:$0xff] %v5090_v56  ;;  %v2738_v39 = vsel %vm430_vm0, %v2731_v33, 0 }
 0x1d0   : > { %5473 = vst [vmem:[#allocation40_spill] sm:$0xff] %v5087_v55  ;;  %v2768_v34 = vand.u32 4294901760, %v2767_v49  ;;  %v5109_v7 = vand.u32 4294901760, %v2738_v39 }
 0x1d1   : > { %3006 = vmatpush.msrb.mxu1 %v4998_v53 }
 0x1d2   : > { %2569 = vmatmul.f32.gmra.mxu1 %v4385_v30  ;;  %v2775_v12 = vsub.f32 %v2738_v39, %v5109_v7 }
 0x1d3   : > { %2659 = vmatmul.f32.gmra.mxu3 %v4387_v31 }
 0x1d4   : > { %v5095_v25 = vpop.f32.mrf.mxu0  ;;  %2622 = vmatmul.f32.gmra.mxu2 %v4387_v31  ;;  %v2732_v31 = vld [vmem:[#allocation6 + $0x10] sm:$0xff] }
 0x1d5   : > { %5475 = vst [vmem:[#allocation42_spill] sm:$0xff] %v5095_v25  ;;  %v2741_v63 = vsel %vm430_vm0, %v2732_v31, 0 }
 0x1d6   : > { %v5103_v41 = vpop.f32.mrf.mxu1  ;;  %v5107_v53 = vpop.f32.mrf.mxu3  ;;  %v5125_v54 = vand.u32 4294901760, %v2741_v63 }
 0x1d7   : > { %2531 = vmatmul.f32.gmra.mxu0 %v4424_v47  ;;  %5476 = vst [vmem:[#allocation43_spill] sm:$0xff] %v5103_v41  ;;  %v5105_v8 = vpop.f32.mrf.mxu2  ;;  %v2769_v47 = vsub.f32 %v2767_v49, %v2768_v34 }
 0x1d8   : > { %v2783_v26 = vsub.f32 %v2741_v63, %v5125_v54 }
 0x1d9   : > { %v2770_v20 = vand.u32 4294901760, %v2769_v47 }
 0x1da   : > { %2575 = vmatmul.f32.gmra.mxu1 %v4441_v58  ;;  %v2776_v58 = vand.u32 4294901760, %v2775_v12  ;;  %v2784_v0 = vand.u32 4294901760, %v2783_v26 }
 0x1db   : > { %2663 = vmatmul.f32.gmra.mxu3 %v4443_v59 }
 0x1dc   : > { %v5111_v30 = vpop.f32.mrf.mxu0  ;;  %2626 = vmatmul.f32.gmra.mxu2 %v4443_v59  ;;  %v2733_v59 = vld [vmem:[#allocation6 + $0x18] sm:$0xff]  ;;  %v2785_v16 = vsub.f32 %v2783_v26, %v2784_v0 }
 0x1dd   : > { %5477 = vst [vmem:[#allocation44_spill] sm:$0xff] %v5111_v30  ;;  %v2744_v42 = vsel %vm430_vm0, %v2733_v59, 0 }
 0x1de   : > { %v5119_v1 = vpop.f32.mrf.mxu1  ;;  %v5123_v61 = vpop.f32.mrf.mxu3  ;;  %v5138_v6 = vand.u32 4294901760, %v2744_v42 }
 0x1df   : > { %2536 = vmatmul.f32.gmra.mxu0 %v4457_v13  ;;  %5478 = vst [vmem:[#allocation45_spill] sm:$0xff] %v5119_v1  ;;  %v5121_v36 = vpop.f32.mrf.mxu2  ;;  %v2777_v13 = vsub.f32 %v2775_v12, %v2776_v58 }
 0x1e0   : > { %5479 = vst [vmem:[#allocation46_spill] sm:$0xff] %v5121_v36  ;;  %v2791_v21 = vsub.f32 %v2744_v42, %v5138_v6 }
 0x1e1   : > { %5480 = vst [vmem:[#allocation47_spill] sm:$0xff] %v5123_v61  ;;  %v2778_v10 = vand.u32 4294901760, %v2777_v13 }
 0x1e2   : > { %2581 = vmatmul.f32.gmra.mxu1 %v4465_v17  ;;  %v2792_v31 = vand.u32 4294901760, %v2791_v21 }
 0x1e3   : > { %2920 = vmatmul.f32.vlgmr.msra.gmra.mxu3 %v2768_v34  ;;  %v2786_v34 = vand.u32 4294901760, %v2785_v16 }
 0x1e4   : > { %v5127_v22 = vpop.f32.mrf.mxu0  ;;  %2878 = vmatmul.f32.vlgmr.msra.gmra.mxu2 %v2767_v49 }
 0x1e6   : > { %v5132_v46 = vpop.f32.mrf.mxu1  ;;  %v5136_v62 = vpop.f32.mrf.mxu3 }
 0x1e7   : > { %2771 = vmatmul.f32.vlgmr.msra.gmra.mxu0 %v2770_v20  ;;  %v5134_v15 = vpop.f32.mrf.mxu2 }
 0x1ea   : > { %2836 = vmatmul.f32.vlgmr.msra.gmra.mxu1 %v5093_v18 }
 0x1eb   : > { %2926 = vmatmul.f32.gmra.mxu3 %v2776_v58 }
 0x1ec   : > { %v5140_v17 = vpop.f32.mrf.mxu0  ;;  %2883 = vmatmul.f32.gmra.mxu2 %v2775_v12  ;;  %v2793_v12 = vsub.f32 %v2791_v21, %v2792_v31 }
 0x1ed   : > { %5481 = vst [vmem:[#allocation48_spill] sm:$0xff] %v5140_v17 }
 0x1ee   : > { %v5144_v33 = vpop.f32.mrf.mxu1  ;;  %v5148_v39 = vpop.f32.mrf.mxu3  ;;  %v2794_v59 = vand.u32 4294901760, %v2793_v12 }
 0x1ef   : > { %2779 = vmatmul.f32.gmra.mxu0 %v2778_v10  ;;  %5482 = vst [vmem:[#allocation49_spill] sm:$0xff] %v5144_v33  ;;  %v5146_v49 = vpop.f32.mrf.mxu2 }
 0x1f0   : > { %5483 = vst [vmem:[#allocation50_spill] sm:$0xff] %v5146_v49 }
 0x1f1   : > { %5484 = vst [vmem:[#allocation51_spill] sm:$0xff] %v5148_v39 }
 0x1f2   : > { %2840 = vmatmul.f32.gmra.mxu1 %v5109_v7 }
 0x1f3   : > { %2932 = vmatmul.f32.gmra.mxu3 %v2784_v0 }
 0x1f4   : > { %v5150_v47 = vpop.f32.mrf.mxu0  ;;  %2888 = vmatmul.f32.gmra.mxu2 %v2783_v26 }
 0x1f6   : > { %v5153_v63 = vpop.f32.mrf.mxu1  ;;  %v5157_v58 = vpop.f32.mrf.mxu3 }
 0x1f7   : > { %2787 = vmatmul.f32.gmra.mxu0 %v2786_v34  ;;  %5485 = vst [vmem:[#allocation52_spill] sm:$0xff] %v5153_v63  ;;  %v5155_v20 = vpop.f32.mrf.mxu2 }
 0x1f8   : > { %5486 = vst [vmem:[#allocation53_spill] sm:$0xff] %v5155_v20 }
 0x1f9   : > { %5487 = vst [vmem:[#allocation54_spill] sm:$0xff] %v5157_v58 }
 0x1fa   : > { %2844 = vmatmul.f32.gmra.mxu1 %v5125_v54 }
 0x1fb   : > { %2938 = vmatmul.f32.gmra.mxu3 %v2792_v31 }
 0x1fc   : > { %v5159_v13 = vpop.f32.mrf.mxu0  ;;  %2893 = vmatmul.f32.gmra.mxu2 %v2791_v21 }
 0x1fd   : > { %5488 = vst [vmem:[#allocation55_spill] sm:$0xff] %v5159_v13 }
 0x1fe   : > { %v5162_v42 = vpop.f32.mrf.mxu1  ;;  %v5166_v10 = vpop.f32.mrf.mxu3 }
 0x1ff   : > { %2795 = vmatmul.f32.gmra.mxu0 %v2794_v59  ;;  %5489 = vst [vmem:[#allocation56_spill] sm:$0xff] %v5162_v42  ;;  %v5164_v26 = vpop.f32.mrf.mxu2 }
 0x200   : > { %5490 = vst [vmem:[#allocation57_spill] sm:$0xff] %v5164_v26 }
 0x201   : > { %5491 = vst [vmem:[#allocation58_spill] sm:$0xff] %v5166_v10 }
 0x202   : > { %2848 = vmatmul.f32.gmra.mxu1 %v5138_v6 }
 0x204   : > { %v2137_v0 = vpop.f32.mrf.mxu0 }
 0x206   : > { %v2202_v16 = vpop.f32.mrf.mxu1  ;;  %v2286_v39 = vpop.f32.mrf.mxu3 }
 0x207   : > { %2971 = vmatmul.f32.vlgmr.msrb.gmra.mxu0 %v5093_v18  ;;  %v2244_v34 = vpop.f32.mrf.mxu2  ;;  %v2203_v12 = vadd.f32 %v2202_v16, %v2137_v0 }
 0x209   : > { %v2245_v1 = vadd.f32 %v2244_v34, %v2203_v12 }
 0x20a   : > { %3008 = vmatmul.f32.vlgmr.msrb.gmra.mxu1 %v5093_v18 }
 0x20b   : > { %v2287_v21 = vadd.f32 %v2286_v39, %v2245_v1 }
 0x20c   : > { %v2145_v49 = vpop.f32.mrf.mxu0 }
 0x20e   : > { %v2206_v31 = vpop.f32.mrf.mxu1  ;;  %v2292_v10 = vpop.f32.mrf.mxu3 }
 0x20f   : > { %2975 = vmatmul.f32.gmra.mxu0 %v5109_v7  ;;  %v2249_v59 = vpop.f32.mrf.mxu2  ;;  %v2207_v30 = vadd.f32 %v2206_v31, %v2145_v49 }
 0x211   : > { %v2250_v26 = vadd.f32 %v2249_v59, %v2207_v30 }
 0x212   : > { %3012 = vmatmul.f32.gmra.mxu1 %v5109_v7 }
 0x213   : > { %v2293_v33 = vadd.f32 %v2292_v10, %v2250_v26 }
 0x214   : > { %v2153_v3 = vpop.f32.mrf.mxu0 }
 0x216   : > { %v2210_v0 = vpop.f32.mrf.mxu1  ;;  %v2298_v34 = vpop.f32.mrf.mxu3 }
 0x217   : > { %2979 = vmatmul.f32.gmra.mxu0 %v5125_v54  ;;  %v2254_v16 = vpop.f32.mrf.mxu2  ;;  %v2211_v29 = vadd.f32 %v2210_v0, %v2153_v3 }
 0x219   : > { %v2255_v18 = vadd.f32 %v2254_v16, %v2211_v29 }
 0x21a   : > { %3016 = vmatmul.f32.gmra.mxu1 %v5125_v54 }
 0x21b   : > { %v2299_v1 = vadd.f32 %v2298_v34, %v2255_v18 }
 0x21c   : > { %v2161_v12 = vpop.f32.mrf.mxu0 }
 0x21e   : > { %v2214_v49 = vpop.f32.mrf.mxu1  ;;  %v2304_v30 = vpop.f32.mrf.mxu3 }
 0x21f   : > { %2983 = vmatmul.f32.gmra.mxu0 %v5138_v6  ;;  %v2259_v39 = vpop.f32.mrf.mxu2  ;;  %v2215_v31 = vadd.f32 %v2214_v49, %v2161_v12 }
 0x221   : > { %v2260_v59 = vadd.f32 %v2259_v39, %v2215_v31 }
 0x222   : > { %3020 = vmatmul.f32.gmra.mxu1 %v5138_v6 }
 0x223   : > { %v2305_v10 = vadd.f32 %v2304_v30, %v2260_v59 }
 0x224   : > { %v2337_v7 = vpop.f32.mrf.mxu0 }
 0x225   : > { %v2338_v26 = vadd.f32 %v2337_v7, %v2287_v21 }
 0x226   : > { %v2374_v17 = vpop.f32.mrf.mxu1  ;;  %v2480_v29 = vpop.f32.mrf.mxu3 }
 0x227   : > { %v2415_v3 = vpop.f32.mrf.mxu2  ;;  %v5177_v0 = vadd.f32 %v2374_v17, %v2338_v26 }
 0x228   : > { %v2481_v16 = vadd.f32 %v2480_v29, %v2415_v3 }
 0x229   : > { %5492 = vst [vmem:[#allocation59_spill] sm:$0xff] %v5177_v0 }
 0x22c   : > { %v2341_v54 = vpop.f32.mrf.mxu0 }
 0x22d   : > { %v2342_v34 = vadd.f32 %v2341_v54, %v2293_v33 }
 0x22e   : > { %v2484_v12 = vpop.f32.mrf.mxu3 }
 0x22f   : > { %v2378_v18 = vpop.f32.mrf.mxu1  ;;  %v2423_v42 = vpop.f32.mrf.mxu2 }
 0x230   : > { %v5179_v58 = vadd.f32 %v2378_v18, %v2342_v34  ;;  %v2485_v49 = vadd.f32 %v2484_v12, %v2423_v42 }
 0x232   : > { %5493 = vst [vmem:[#allocation60_spill] sm:$0xff] %v5179_v58 }
 0x234   : > { %v2345_v39 = vpop.f32.mrf.mxu0 }
 0x235   : > { %v2346_v31 = vadd.f32 %v2345_v39, %v2299_v1 }
 0x236   : > { %v2488_v30 = vpop.f32.mrf.mxu3 }
 0x237   : > { %v2382_v41 = vpop.f32.mrf.mxu1  ;;  %v2431_v6 = vpop.f32.mrf.mxu2 }
 0x238   : > { %v5181_v21 = vadd.f32 %v2382_v41, %v2346_v31  ;;  %v2489_v59 = vadd.f32 %v2488_v30, %v2431_v6 }
 0x23a   : > { %5494 = vst [vmem:[#allocation61_spill] sm:$0xff] %v5181_v21 }
 0x23c   : > { %v2349_v17 = vpop.f32.mrf.mxu0 }
 0x23d   : > { %v2350_v7 = vadd.f32 %v2349_v17, %v2305_v10 }
 0x23e   : > { %v2492_v33 = vpop.f32.mrf.mxu3 }
 0x23f   : > { %v2386_v26 = vpop.f32.mrf.mxu1  ;;  %v2439_v3 = vpop.f32.mrf.mxu2 }
 0x240   : > { %v5183_v29 = vadd.f32 %v2386_v26, %v2350_v7  ;;  %v2493_v54 = vadd.f32 %v2492_v33, %v2439_v3 }
 0x242   : > { %5495 = vst [vmem:[#allocation62_spill] sm:$0xff] %v5183_v29 }
 0x244   : > { %v2522_v34 = vpop.f32.mrf.mxu0 }
 0x245   : > { %v2523_v18 = vadd.f32 %v2522_v34, %v2481_v16 }
 0x246   : > { %v2652_v1 = vpop.f32.mrf.mxu3 }
 0x247   : > { %v2564_v58 = vpop.f32.mrf.mxu1  ;;  %v2615_v42 = vpop.f32.mrf.mxu2 }
 0x248   : > { %v2565_v12 = vadd.f32 %v2564_v58, %v2523_v18 }
 0x24a   : > { %v2616_v13 = vadd.f32 %v2615_v42, %v2565_v12 }
 0x24c   : > { %v2527_v39 = vpop.f32.mrf.mxu0  ;;  %v5185_v31 = vadd.f32 %v2652_v1, %v2616_v13 }
 0x24d   : > { %v2528_v41 = vadd.f32 %v2527_v39, %v2485_v49 }
 0x24e   : > { %5496 = vst [vmem:[#allocation63_spill] sm:$0xff] %v5185_v31  ;;  %v2656_v17 = vpop.f32.mrf.mxu3 }
 0x24f   : > { %v2570_v6 = vpop.f32.mrf.mxu1  ;;  %v2619_v30 = vpop.f32.mrf.mxu2 }
 0x250   : > { %v2571_v10 = vadd.f32 %v2570_v6, %v2528_v41 }
 0x252   : > { %v2620_v7 = vadd.f32 %v2619_v30, %v2571_v10 }
 0x254   : > { %v2532_v21 = vpop.f32.mrf.mxu0  ;;  %v5187_v29 = vadd.f32 %v2656_v17, %v2620_v7 }
 0x255   : > { %v2533_v26 = vadd.f32 %v2532_v21, %v2489_v59 }
 0x256   : > { %5497 = vst [vmem:[#allocation64_spill] sm:$0xff] %v5187_v29  ;;  %v2660_v34 = vpop.f32.mrf.mxu3 }
 0x257   : > { %v2576_v3 = vpop.f32.mrf.mxu1  ;;  %v2623_v16 = vpop.f32.mrf.mxu2 }
 0x258   : > { %v2577_v33 = vadd.f32 %v2576_v3, %v2533_v26 }
 0x25a   : > { %v2624_v18 = vadd.f32 %v2623_v16, %v2577_v33 }
 0x25c   : > { %v2537_v58 = vpop.f32.mrf.mxu0  ;;  %v5189_v42 = vadd.f32 %v2660_v34, %v2624_v18 }
 0x25d   : > { %v2538_v25 = vadd.f32 %v2537_v58, %v2493_v54 }
 0x25e   : > { %5498 = vst [vmem:[#allocation65_spill] sm:$0xff] %v5189_v42  ;;  %v2664_v1 = vpop.f32.mrf.mxu3 }
 0x25f   : > { %v2582_v13 = vpop.f32.mrf.mxu1  ;;  %v2627_v49 = vpop.f32.mrf.mxu2 }
 0x260   : > { %v2583_v12 = vadd.f32 %v2582_v13, %v2538_v25 }
 0x262   : > { %v2628_v39 = vadd.f32 %v2627_v49, %v2583_v12 }
 0x264   : > { %v2772_v41 = vpop.f32.mrf.mxu0  ;;  %v5191_v6 = vadd.f32 %v2664_v1, %v2628_v39 }
 0x266   : > { %5499 = vst [vmem:[#allocation66_spill] sm:$0xff] %v5191_v6  ;;  %v2921_v3 = vpop.f32.mrf.mxu3 }
 0x267   : > { %v2837_v21 = vpop.f32.mrf.mxu1  ;;  %v2879_v17 = vpop.f32.mrf.mxu2 }
 0x268   : > { %v2838_v49 = vadd.f32 %v2837_v21, %v2772_v41 }
 0x26a   : > { %v2880_v6 = vadd.f32 %v2879_v17, %v2838_v49 }
 0x26c   : > { %v2780_v59 = vpop.f32.mrf.mxu0  ;;  %v2922_v0 = vadd.f32 %v2921_v3, %v2880_v6 }
 0x26e   : > { %v2927_v34 = vpop.f32.mrf.mxu3 }
 0x26f   : > { %v2841_v30 = vpop.f32.mrf.mxu1  ;;  %v2884_v54 = vpop.f32.mrf.mxu2 }
 0x270   : > { %v2842_v18 = vadd.f32 %v2841_v30, %v2780_v59  ;;  %v3038_v30 = vld [vmem:[#allocation8] sm:$0xff] }
 0x271   : > { %v3043_v17 = vsel %vm430_vm0, %v3038_v30, 0 }
 0x272   : > { %v2885_v1 = vadd.f32 %v2884_v54, %v2842_v18  ;;  %v3029_v54 = vstv %s3024_s28 }
 0x274   : > { %v2788_v10 = vpop.f32.mrf.mxu0  ;;  %v2928_v4 = vadd.f32 %v2927_v34, %v2885_v1 }
 0x276   : > { %v2933_v39 = vpop.f32.mrf.mxu3 }
 0x277   : > { %v2845_v7 = vpop.f32.mrf.mxu1  ;;  %v2889_v13 = vpop.f32.mrf.mxu2 }
 0x278   : > { %v2846_v12 = vadd.f32 %v2845_v7, %v2788_v10 }
 0x27a   : > { %v2890_v42 = vadd.f32 %v2889_v13, %v2846_v12 }
 0x27c   : > { %v2796_v26 = vpop.f32.mrf.mxu0  ;;  %v2934_v20 = vadd.f32 %v2933_v39, %v2890_v42 }
 0x27e   : > { %v2939_v7 = vpop.f32.mrf.mxu3 }
 0x27f   : > { %v2849_v16 = vpop.f32.mrf.mxu1  ;;  %v2894_v2 = vpop.f32.mrf.mxu2 }
 0x280   : > { %v2850_v56 = vadd.f32 %v2849_v16, %v2796_v26 }
 0x282   : > { %v2895_v41 = vadd.f32 %v2894_v2, %v2850_v56 }
 0x284   : > { %v2972_v33 = vpop.f32.mrf.mxu0  ;;  %v2940_v6 = vadd.f32 %v2939_v7, %v2895_v41  ;;  %v3040_v41 = vld [vmem:[#allocation8 + $0x10] sm:$0xff] }
 0x285   : > { %v2973_v61 = vadd.f32 %v2972_v33, %v2922_v0  ;;  %v5194_v0 = vand.u32 4294901760, %v3043_v17 }
 0x287   : > { %v3009_v58 = vpop.f32.mrf.mxu1 }
 0x288   : > { %v3010_v21 = vadd.f32 %v3009_v58, %v2973_v61  ;;  %v3039_v61 = vld [vmem:[#allocation8 + $0x8] sm:$0xff] }
 0x289   : > { %v3046_v33 = vsel %vm430_vm0, %v3039_v61, 0 }
 0x28a   : > { %vm3025_vm6 = vcmp.gt.f32.partialorder %v3010_v21, 0.0  ;;  %v5206_v1 = vand.u32 4294901760, %v3046_v33 }
 0x28c   : > { %v2976_v25 = vpop.f32.mrf.mxu0 }
 0x28d   : > { %v2977_v55 = vadd.f32 %v2976_v25, %v2928_v4  ;;  %v3030_v4 = vmul.f32 %v3029_v54, %v3010_v21 }
 0x28f   : > { %v3013_v29 = vpop.f32.mrf.mxu1 }
 0x290   : > { %v3014_v36 = vadd.f32 %v3013_v29, %v2977_v55 }
 0x292   : > { %v3031_v18 = vmul.f32 %v3029_v54, %v3014_v36  ;;  %vm3026_vm5 = vcmp.gt.f32.partialorder %v3014_v36, 0.0 }
 0x294   : > { %v2980_v31 = vpop.f32.mrf.mxu0  ;;  %v3035_v55 = vsel %vm3026_vm5, %v3014_v36, %v3031_v18 }
 0x295   : > { %v2981_v59 = vadd.f32 %v2980_v31, %v2934_v20  ;;  %v3075_v31 = vsub.f32 %v3043_v17, %v5194_v0  ;;  %v5199_v3 = vand.u32 4294901760, %v3035_v55  ;;  %v3049_v17 = vsel %vm430_vm0, %v3040_v41, 0 }
 0x297   : > { %v3017_v63 = vpop.f32.mrf.mxu1  ;;  %v3076_v13 = vand.u32 4294901760, %v3075_v31  ;;  %v3132_v12 = vsub.f32 %v3035_v55, %v5199_v3 }
 0x298   : > { %v3018_v10 = vadd.f32 %v3017_v63, %v2981_v59  ;;  %v3034_v63 = vsel %vm3025_vm6, %v3010_v21, %v3030_v4 }
 0x299   : > { %v5202_v58 = vand.u32 4294901760, %v3034_v63  ;;  %v3077_v21 = vsub.f32 %v3075_v31, %v3076_v13  ;;  %v3133_v7 = vand.u32 4294901760, %v3132_v12 }
 0x29a   : > { %vm3027_vm4 = vcmp.gt.f32.partialorder %v3018_v10, 0.0  ;;  %v3032_v34 = vmul.f32 %v3029_v54, %v3018_v10 }
 0x29b   : > { %v3138_v59 = vsub.f32 %v3034_v63, %v5202_v58  ;;  %v3041_v63 = vld [vmem:[#allocation8 + $0x18] sm:$0xff] }
 0x29c   : > { %v2984_v42 = vpop.f32.mrf.mxu0  ;;  %v3036_v26 = vsel %vm3027_vm4, %v3018_v10, %v3032_v34 }
 0x29d   : > { %v2985_v20 = vadd.f32 %v2984_v42, %v2940_v6  ;;  %v5196_v2 = vand.u32 4294901760, %v3036_v26  ;;  %v3139_v42 = vand.u32 4294901760, %v3138_v59  ;;  %v3078_v6 = vand.u32 4294901760, %v3077_v21 }
 0x29f   : > { %v3021_v56 = vpop.f32.mrf.mxu1  ;;  %v3126_v25 = vsub.f32 %v3036_v26, %v5196_v2  ;;  %v3134_v26 = vsub.f32 %v3132_v12, %v3133_v7  ;;  %v3140_v61 = vsub.f32 %v3138_v59, %v3139_v42 }
 0x2a0   : > { %v3022_v29 = vadd.f32 %v3021_v56, %v2985_v20  ;;  %v3090_v20 = vand.u32 4294901760, %v3049_v17 }
 0x2a1   : > { %v3127_v30 = vand.u32 4294901760, %v3126_v25 }
 0x2a2   : > { %vm3028_vm7 = vcmp.gt.f32.partialorder %v3022_v29, 0.0  ;;  %v3033_v16 = vmul.f32 %v3029_v54, %v3022_v29  ;;  %v3083_v54 = vsub.f32 %v3046_v33, %v5206_v1  ;;  %v3091_v33 = vsub.f32 %v3049_v17, %v3090_v20 }
 0x2a3   : > { %v3128_v34 = vsub.f32 %v3126_v25, %v3127_v30 }
 0x2a4   : > { %v3037_v36 = vsel %vm3028_vm7, %v3022_v29, %v3033_v16  ;;  %v3084_v55 = vand.u32 4294901760, %v3083_v54  ;;  %v3135_v29 = vand.u32 4294901760, %v3134_v26 }
 0x2a5   : > { %v3066_v49 = vand.u32 4294901760, %v3037_v36  ;;  %v3129_v56 = vand.u32 4294901760, %v3128_v34 }
 0x2a6   : > { %v3085_v16 = vsub.f32 %v3083_v54, %v3084_v55 }
 0x2a7   : > { %v3120_v39 = vsub.f32 %v3037_v36, %v3066_v49  ;;  %3067 = vmatpush.msrb.mxu2 %v3066_v49  ;;  %3218 = vmatpush.msra.mxu1 %v3066_v49  ;;  %v3141_v36 = vand.u32 4294901760, %v3140_v61 }
 0x2a9   : > { %3069 = vmatpush.msrb.mxu2 %v5196_v2  ;;  %3174 = vmatpush.msra.mxu0 %v3120_v39  ;;  %v3121_v10 = vand.u32 4294901760, %v3120_v39 }
 0x2aa   : > { %3220 = vmatpush.msra.mxu1 %v5196_v2 }
 0x2ab   : > { %3071 = vmatpush.msrb.mxu2 %v5199_v3  ;;  %3177 = vmatpush.msra.mxu0 %v3126_v25  ;;  %v3122_v18 = vsub.f32 %v3120_v39, %v3121_v10  ;;  %v3052_v25 = vsel %vm430_vm0, %v3041_v63, 0  ;;  %v3092_v39 = vand.u32 4294901760, %v3091_v33 }
 0x2ac   : > { %3222 = vmatpush.msra.mxu1 %v5199_v3  ;;  %v3098_v41 = vand.u32 4294901760, %v3052_v25 }
 0x2ad   : > { %3073 = vmatpush.msrb.mxu2 %v5202_v58  ;;  %3180 = vmatpush.msra.mxu0 %v3132_v12  ;;  %v3123_v4 = vand.u32 4294901760, %v3122_v18  ;;  %v3086_v12 = vand.u32 4294901760, %v3085_v16  ;;  %v4100_v16 = vmov 3  }
 0x2ae   : > { %3224 = vmatpush.msra.mxu1 %v5202_v58  ;;  %3079 = vmatmul.f32.vlgmr.msrb.gmra.mxu2 %v3078_v6 }
 0x2af   : > { %3265 = vmatpush.msra.mxu2 %v3121_v10  ;;  %3124 = vmatpush.msrb.mxu3 %v3123_v4 }
 0x2b0   : > { %3183 = vmatpush.msra.mxu0 %v3138_v59  ;;  %3228 = vmatmul.f32.vlgmr.msra.gmra.mxu1 %v3076_v13  ;;  %v3099_v59 = vsub.f32 %v3052_v25, %v3098_v41 }
 0x2b1   : > { %3269 = vmatpush.msra.mxu2 %v3127_v30  ;;  %3186 = vmatmul.f32.vlgmr.msra.gmra.mxu0 %v3075_v31  ;;  %v3093_v31 = vsub.f32 %v3091_v33, %v3092_v39 }
 0x2b2   : > { %3130 = vmatpush.msrb.mxu3 %v3129_v56  ;;  %v3100_v30 = vand.u32 4294901760, %v3099_v59  ;;  %3838 = vset.pattern.permute.xlu2 %v4100_v16 }
 0x2b3   : > { %3273 = vmatpush.msra.mxu2 %v3133_v7  ;;  %v3094_v13 = vand.u32 4294901760, %v3093_v31 }
 0x2b4   : > { %3136 = vmatpush.msrb.mxu3 %v3135_v29  ;;  %v3101_v21 = vsub.f32 %v3099_v59, %v3100_v30 }
 0x2b5   : > { %3277 = vmatpush.msra.mxu2 %v3139_v42 }
 0x2b6   : > { %3142 = vmatpush.msrb.mxu3 %v3141_v36  ;;  %3087 = vmatmul.f32.gmra.mxu2 %v3086_v12 }
 0x2b7   : > { %3144 = vmatmul.f32.vlgmr.msrb.gmra.mxu3 %v5194_v0 }
 0x2b8   : > { %3308 = vmatpush.msra.mxu3 %v3066_v49  ;;  %3234 = vmatmul.f32.gmra.mxu1 %v3084_v55  ;;  %v3102_v49 = vand.u32 4294901760, %v3101_v21 }
 0x2b9   : > { %3191 = vmatmul.f32.gmra.mxu0 %v3083_v54 }
 0x2ba   : > { %3310 = vmatpush.msra.mxu3 %v5196_v2 }
 0x2bc   : > { %3312 = vmatpush.msra.mxu3 %v5199_v3 }
 0x2be   : > { %3314 = vmatpush.msra.mxu3 %v5202_v58  ;;  %3095 = vmatmul.f32.gmra.mxu2 %v3094_v13 }
 0x2bf   : > { %3148 = vmatmul.f32.gmra.mxu3 %v5206_v1 }
 0x2c0   : > { %3240 = vmatmul.f32.gmra.mxu1 %v3092_v39 }
 0x2c1   : > { %3196 = vmatmul.f32.gmra.mxu0 %v3091_v33  ;;  %v4101_v33 = vmov 0  }
 0x2c2   : > { %3835 = vset.pattern.permute.xlu1 %v4101_v33 }
 0x2c6   : > { %3103 = vmatmul.f32.gmra.mxu2 %v3102_v49 }
 0x2c7   : > { %3152 = vmatmul.f32.gmra.mxu3 %v3090_v20 }
 0x2c8   : > { %3246 = vmatmul.f32.gmra.mxu1 %v3100_v30 }
 0x2c9   : > { %3201 = vmatmul.f32.gmra.mxu0 %v3099_v59  ;;  %v4102_v59 = vmov 2  }
 0x2ca   : > { %3841 = vset.pattern.permute.xlu0 %v4102_v59 }
 0x2ce   : > { %3279 = vmatmul.f32.vlgmr.msra.gmra.mxu2 %v5194_v0 }
 0x2cf   : > { %3156 = vmatmul.f32.gmra.mxu3 %v3098_v41 }
 0x2d6   : > { %3283 = vmatmul.f32.gmra.mxu2 %v5206_v1 }
 0x2d7   : > { %3316 = vmatmul.f32.vlgmr.msra.gmra.mxu3 %v5194_v0 }
 0x2de   : > { %3287 = vmatmul.f32.gmra.mxu2 %v3090_v20 }
 0x2df   : > { %3320 = vmatmul.f32.gmra.mxu3 %v5206_v1 }
 0x2e6   : > { %3291 = vmatmul.f32.gmra.mxu2 %v3098_v41 }
 0x2e7   : > { %3324 = vmatmul.f32.gmra.mxu3 %v3090_v20 }
 0x2ef   : > { %3328 = vmatmul.f32.gmra.mxu3 %v3098_v41 }
 0x32d   : > { %v3229_v34 = vpop.f32.mrf.mxu1 }
 0x32e   : > { %v3187_v17 = vpop.f32.mrf.mxu0 }
 0x331   : > { %v3080_v2 = vpop.f32.mrf.mxu2 }
 0x335   : > { %v3235_v56 = vpop.f32.mrf.mxu1 }
 0x336   : > { %v3192_v4 = vpop.f32.mrf.mxu0 }
 0x339   : > { %v3088_v58 = vpop.f32.mrf.mxu2 }
 0x33a   : > { %v3145_v3 = vpop.f32.mrf.mxu3 }
 0x33b   : > { %v3146_v42 = vadd.f32 %v3145_v3, %v3080_v2 }
 0x33d   : > { %v3188_v0 = vadd.f32 %v3187_v17, %v3146_v42  ;;  %v3241_v30 = vpop.f32.mrf.mxu1 }
 0x33e   : > { %v3197_v12 = vpop.f32.mrf.mxu0 }
 0x33f   : > { %v3230_v1 = vadd.f32 %v3229_v34, %v3188_v0 }
 0x341   : > { %v3096_v7 = vpop.f32.mrf.mxu2 }
 0x342   : > { %v3149_v10 = vpop.f32.mrf.mxu3 }
 0x343   : > { %v3150_v55 = vadd.f32 %v3149_v10, %v3088_v58 }
 0x345   : > { %v3193_v29 = vadd.f32 %v3192_v4, %v3150_v55 }
 0x346   : > { %v3202_v42 = vpop.f32.mrf.mxu0 }
 0x347   : > { %v3236_v41 = vadd.f32 %v3235_v56, %v3193_v29 }
 0x349   : > { %v3104_v18 = vpop.f32.mrf.mxu2 }
 0x34a   : > { %v3153_v54 = vpop.f32.mrf.mxu3 }
 0x34b   : > { %v3154_v39 = vadd.f32 %v3153_v54, %v3096_v7 }
 0x34d   : > { %v3198_v49 = vadd.f32 %v3197_v12, %v3154_v39 }
 0x34f   : > { %v3242_v34 = vadd.f32 %v3241_v30, %v3198_v49 }
 0x351   : > { %v3280_v26 = vpop.f32.mrf.mxu2 }
 0x352   : > { %v3157_v6 = vpop.f32.mrf.mxu3  ;;  %v3281_v20 = vadd.f32 %v3280_v26, %v3230_v1  ;;  %v3247_v26 = vpop.f32.mrf.mxu1 }
 0x353   : > { %v3158_v17 = vadd.f32 %v3157_v6, %v3104_v18 }
 0x355   : > { %v3203_v4 = vadd.f32 %v3202_v42, %v3158_v17 }
 0x359   : > { %v3284_v36 = vpop.f32.mrf.mxu2 }
 0x35a   : > { %v3317_v61 = vpop.f32.mrf.mxu3  ;;  %v3285_v31 = vadd.f32 %v3284_v36, %v3236_v41 }
 0x35b   : > { %v3318_v63 = vadd.f32 %v3317_v61, %v3281_v20 }
 0x35d   : > { %v3731_v25 = vmul.f32 -1.442695, %v3318_v63  ;;  %v3248_v63 = vadd.f32 %v3247_v26, %v3203_v4 }
 0x35f   : > { %3851 = vpow2.f32 %v3731_v25 }
 0x361   : > { %v3288_v58 = vpop.f32.mrf.mxu2 }
 0x362   : > { %v3321_v13 = vpop.f32.mrf.mxu3  ;;  %v3289_v7 = vadd.f32 %v3288_v58, %v3242_v34 }
 0x363   : > { %v3322_v21 = vadd.f32 %v3321_v13, %v3285_v31 }
 0x365   : > { %v3852_v2 = vpop.eup %3851  ;;  %v3732_v3 = vmul.f32 -1.442695, %v3322_v21 }
 0x366   : > { %v3344_v10 = vadd.f32 1.0, %v3852_v2 }
 0x367   : > { %3853 = vpow2.f32 %v3732_v3 }
 0x368   : > { %3855 = vrcp.f32 %v3344_v10  ;;  %v3359_v36 = vand.u32 2147483648, %v3344_v10  ;;  %v3357_v41 = vand.u32 2147483647, %v3344_v10  ;;  %vm3353_vm9 = vweird.f32 %v3344_v10 }
 0x369   : > { %v3292_v61 = vpop.f32.mrf.mxu2 }
 0x36a   : > { %v3325_v54 = vpop.f32.mrf.mxu3  ;;  %v3293_v25 = vadd.f32 %v3292_v61, %v3248_v63  ;;  %v3360_v2 = vor.u32 1.1754944e-38, %v3359_v36  ;;  %vm3358_vm11 = vcmp.eq.f32.partialorder %v3357_v41, 8.507059e+37 }
 0x36b   : > { %v3326_v0 = vadd.f32 %v3325_v54, %v3289_v7 }
 0x36d   : > { %v3854_v55 = vpop.eup %3853  ;;  %v3733_v1 = vmul.f32 -1.442695, %v3326_v0 }
 0x36e   : > { %v3856_v56 = vpop.eup %3855  ;;  %v3345_v20 = vadd.f32 1.0, %v3854_v55 }
 0x36f   : > { %3857 = vpow2.f32 %v3733_v1  ;;  %v3349_v29 = vmul.f32 %v3856_v56, %v3344_v10  ;;  %vm3354_vm8 = vweird.f32 %v3856_v56 }
 0x370   : > { %3859 = vrcp.f32 %v3345_v20  ;;  %vm3355_vm10 = vmor %vm3353_vm9, %vm3354_vm8  ;;  %v3374_v42 = vand.u32 2147483648, %v3345_v20  ;;  %v3372_v54 = vand.u32 2147483647, %v3345_v20  ;;  %vm3368_vm13 = vweird.f32 %v3345_v20 }
 0x371   : > { %v3350_v18 = vsub.f32 1.0, %v3349_v29  ;;  %v4103_v29 = vmov 1  }
 0x372   : > { %v3329_v6 = vpop.f32.mrf.mxu3  ;;  %v3375_v55 = vor.u32 1.1754944e-38, %v3374_v42  ;;  %vm3373_vm15 = vcmp.eq.f32.partialorder %v3372_v54, 8.507059e+37 }
 0x373   : > { %v3330_v12 = vadd.f32 %v3329_v6, %v3293_v25  ;;  %v3351_v39 = vmul.f32 %v3856_v56, %v3350_v18 }
 0x375   : > { %v3858_v31 = vpop.eup %3857  ;;  %v3734_v13 = vmul.f32 -1.442695, %v3330_v12  ;;  %v3352_v30 = vadd.f32 %v3856_v56, %v3351_v39 }
 0x376   : > { %v3860_v21 = vpop.eup %3859  ;;  %v3346_v49 = vadd.f32 1.0, %v3858_v31 }
 0x377   : > { %3861 = vpow2.f32 %v3734_v13  ;;  %v3356_v3 = vsel %vm3355_vm10, %v3856_v56, %v3352_v30  ;;  %v3364_v58 = vmul.f32 %v3860_v21, %v3345_v20  ;;  %vm3369_vm12 = vweird.f32 %v3860_v21 }
 0x378   : > { %3863 = vrcp.f32 %v3346_v49  ;;  %v3361_v17 = vsel %vm3358_vm11, %v3360_v2, %v3356_v3  ;;  %vm3370_vm14 = vmor %vm3368_vm13, %vm3369_vm12  ;;  %v3389_v25 = vand.u32 2147483648, %v3346_v49  ;;  %v3387_v20 = vand.u32 2147483647, %v3346_v49 }
 0x379   : > { %3533 = vperm.xlu2 %3838, %v3361_v17   ;;  %3442 = vperm.xlu1 %3835, %v3361_v17   ;;  %v3365_v34 = vsub.f32 1.0, %v3364_v58  ;;  %vm3383_vm1 = vweird.f32 %v3346_v49 }
 0x37a   : > { %v3390_v12 = vor.u32 1.1754944e-38, %v3389_v25  ;;  %vm3388_vm3 = vcmp.eq.f32.partialorder %v3387_v20, 8.507059e+37  ;;  %v1226_v25 = vadd.f32 %v4845_v60, %v4820_v50  ;;  %v5500_v50 = vld [vmem:[#allocation27_spill] sm:$0xff] }
 0x37b   : > { %v3366_v7 = vmul.f32 %v3860_v21, %v3365_v34 }
 0x37d   : > { %v3862_v0 = vpop.eup %3861  ;;  %v3367_v4 = vadd.f32 %v3860_v21, %v3366_v7  ;;  %v1230_v7 = vadd.f32 %v4870_v44, %v4828_v45 }
 0x37e   : > { %v3864_v10 = vpop.eup %3863  ;;  %v3347_v26 = vadd.f32 1.0, %v3862_v0  ;;  %v403_v0 = vld [vmem:[%s5249_s9 + $0x48] sm:$0xff] }
 0x37f   : > { %v3371_v1 = vsel %vm3370_vm14, %v3860_v21, %v3367_v4  ;;  %v3379_v56 = vmul.f32 %v3864_v10, %v3346_v49  ;;  %vm3384_vm0 = vweird.f32 %v3864_v10  ;;  %v1267_v54 = vadd.f32 %v4882_v28, %v1230_v7  ;;  %v404_v4 = vld [vmem:[%s5249_s9 + $0x50] sm:$0xff]  ;;  %v5505_v7 = vld [vmem:[#allocation26_spill] sm:$0xff] }
 0x380   : > { %3865 = vrcp.f32 %v3347_v26  ;;  %v3376_v61 = vsel %vm3373_vm15, %v3375_v55, %v3371_v1  ;;  %vm3385_vm2 = vmor %vm3383_vm1, %vm3384_vm0  ;;  %v3404_v49 = vand.u32 2147483648, %v3347_v26  ;;  %vm3398_vm5 = vweird.f32 %v3347_v26 }
 0x381   : > { %3505 = vperm.xlu0 %3841, %v3376_v61   ;;  %3839 = vset.pattern.permute.xlu2 %v4101_v33  ;;  %v3380_v63 = vsub.f32 1.0, %v3379_v56  ;;  %v3402_v2 = vand.u32 2147483647, %v3347_v26 }
 0x382   : > { %3836 = vset.pattern.permute.xlu1 %v4103_v29  ;;  %3447 = vperm.xlu2 %3839, %v3376_v61   ;;  %v3405_v58 = vor.u32 1.1754944e-38, %v3404_v49 }
 0x383   : > { %3469 = vperm.xlu1 %3836, %v3361_v17   ;;  %v3381_v18 = vmul.f32 %v3864_v10, %v3380_v63  ;;  %vm3403_vm7 = vcmp.eq.f32.partialorder %v3402_v2, 8.507059e+37  ;;  %v1925_v63 = vadd.f32 %v5070_v40, %v5066_v14  ;;  %v1263_v14 = vadd.f32 %v4861_v38, %v1226_v25  ;;  %v394_v40 = vld [vmem:[%s5249_s9] sm:$0xff]  ;;  %v401_v25 = vld [vmem:[%s5249_s9 + $0x38] sm:$0xff] }
 0x385   : > { %v3382_v6 = vadd.f32 %v3864_v10, %v3381_v18 }
 0x386   : > { %v3866_v36 = vpop.eup %3865 }
 0x387   : > { %v3386_v39 = vsel %vm3385_vm2, %v3864_v10, %v3382_v6  ;;  %v3394_v31 = vmul.f32 %v3866_v36, %v3347_v26  ;;  %vm3399_vm4 = vweird.f32 %v3866_v36  ;;  %v405_v10 = vld [vmem:[%s5249_s9 + $0x58] sm:$0xff] }
 0x388   : > { %v3391_v41 = vsel %vm3388_vm3, %v3390_v12, %v3386_v39  ;;  %vm3400_vm6 = vmor %vm3398_vm5, %vm3399_vm4  ;;  %v3419_v45 = vmul.f32 %v4961_v35, %v405_v10  ;;  %v1786_v35 = vadd.f32 %v5072_v19, %v5043_v23  ;;  %v406_v12 = vld [vmem:[%s5249_s9 + $0x60] sm:$0xff]  ;;  %v395_v39 = vld [vmem:[%s5249_s9 + $0x8] sm:$0xff] }
 0x389   : > { %3842 = vset.pattern.permute.xlu0 %v4101_v33  ;;  %v3395_v13 = vsub.f32 1.0, %v3394_v31  ;;  %v396_v19 = vld [vmem:[%s5249_s9 + $0x10] sm:$0xff]  ;;  %v3409_v60 = vmul.f32 %v5500_v50, %v395_v39  ;;  %v5518_v50 = vld [vmem:[#allocation41_spill] sm:$0xff] }
 0x38a   : > { %3452 = vperm.xlu0 %3842, %v3391_v41   ;;  %3840 = vset.pattern.permute.xlu2 %v4103_v29  ;;  %v1823_v18 = vadd.f32 %v5085_v27, %v1786_v35  ;;  %v3410_v31 = vmul.f32 %v1263_v14, %v396_v19  ;;  %v5515_v14 = vld [vmem:[#allocation29_spill] sm:$0xff] }
 0x38b   : > { %3837 = vset.pattern.permute.xlu1 %v4102_v59  ;;  %3473 = vperm.xlu2 %3840, %v3376_v61   ;;  %v3396_v30 = vmul.f32 %v3866_v36, %v3395_v13  ;;  %v5501_v13 = vld [vmem:[#allocation22_spill] sm:$0xff] }
 0x38c   : > { %3501 = vperm.xlu1 %3837, %v3361_v17  }
 0x38d   : > { %v3397_v21 = vadd.f32 %v3866_v36, %v3396_v30  ;;  %v5502_v30 = vld [vmem:[#allocation25_spill] sm:$0xff] }
 0x38f   : > { %v3401_v3 = vsel %vm3400_vm6, %v3866_v36, %v3397_v21  ;;  %v1967_v36 = vadd.f32 %v5127_v22, %v1925_v63  ;;  %v682_v21 = vadd.f32 %v5502_v30, %v5501_v13  ;;  %v5510_v63 = vld [vmem:[#allocation46_spill] sm:$0xff]  ;;  %v5521_v13 = vld [vmem:[#allocation63_spill] sm:$0xff] }
 0x390   : > { %v3406_v17 = vsel %vm3403_vm7, %v3405_v58, %v3401_v3  ;;  %v3415_v30 = vmul.f32 %v5521_v13, %v401_v25  ;;  %v5535_v13 = vld [vmem:[#allocation44_spill] sm:$0xff] }
 0x391   : > { %v2009_v23 = vadd.f32 %v5132_v46, %v1967_v36 }
 0x392   : > { %3849 = vset.pattern.permute.xlu0 %v4100_v16 }
 0x393   : > { %3541 = vperm.xlu0 %3849, %v3391_v41   ;;  %3844 = vset.pattern.permute.xlu2 %v4102_v59  ;;  %v2060_v46 = vadd.f32 %v5134_v15, %v2009_v23 }
 0x394   : > { %3843 = vset.pattern.permute.xlu1 %v4103_v29  ;;  %3509 = vperm.xlu2 %3844, %v3391_v41  }
 0x395   : > { %3477 = vperm.xlu1 %3843, %v3391_v41  }
 0x39c   : > { %3845 = vset.pattern.permute.xlu2 %v4101_v33  ;;  %v674_v33 = vadd.f32 %v4653_v51, %v4587_v57  ;;  %v3417_v57 = vmul.f32 %v4776_v11, %v403_v0  ;;  %v3418_v51 = vmul.f32 %v1267_v54, %v404_v4  ;;  %v5506_v4 = vld [vmem:[#allocation35_spill] sm:$0xff] }
 0x39d   : > { %3847 = vset.pattern.permute.xlu1 %v4102_v59  ;;  %3457 = vperm.xlu2 %3845, %v3406_v17  }
 0x39e   : > { %3513 = vperm.xlu1 %3847, %v3406_v17   ;;  %v711_v59 = vadd.f32 %v4663_v9, %v674_v33 }
 0x3a5   : > { %3846 = vset.pattern.permute.xlu2 %v4103_v29  ;;  %v670_v29 = vadd.f32 %v4631_v52, %v4581_v48  ;;  %v397_v48 = vld [vmem:[%s5249_s9 + $0x18] sm:$0xff]  ;;  %v3420_v52 = vmul.f32 %v1823_v18, %v406_v12 }
 0x3a6   : > { %3848 = vset.pattern.permute.xlu1 %v4100_v16  ;;  %3481 = vperm.xlu2 %3846, %v3406_v17   ;;  %v3411_v38 = vmul.f32 %v4940_v32, %v397_v48  ;;  %v1782_v32 = vadd.f32 %v5054_v43, %v5034_v24  ;;  %v5507_v24 = vld [vmem:[#allocation21_spill] sm:$0xff]  ;;  %v5508_v43 = vld [vmem:[#allocation23_spill] sm:$0xff]  ;;  %v5512_v18 = vld [vmem:[#allocation24_spill] sm:$0xff] }
 0x3a7   : > { %3537 = vperm.xlu1 %3848, %v3376_v61   ;;  %v707_v6 = vadd.f32 %v4644_v37, %v670_v29  ;;  %v1933_v37 = vadd.f32 %v5107_v53, %v5105_v8  ;;  %v5503_v53 = vld [vmem:[#allocation31_spill] sm:$0xff]  ;;  %v5516_v48 = vld [vmem:[#allocation37_spill] sm:$0xff] }
 0x3a8   : > { %v400_v29 = vld [vmem:[%s5249_s9 + $0x30] sm:$0xff] }
 0x3a9   : > { %v3408_v41 = vmul.f32 %v707_v6, %v394_v40  ;;  %v1977_v54 = vadd.f32 %v5150_v47, %v1933_v37  ;;  %v421_v47 = vld [vmem:[%s5249_s9 + $0xd8] sm:$0xff]  ;;  %v5513_v6 = vld [vmem:[#allocation30_spill] sm:$0xff]  ;;  %v5519_v37 = vld [vmem:[#allocation53_spill] sm:$0xff] }
 0x3ae   : > { %3850 = vset.pattern.permute.xlu2 %v4100_v16  ;;  %v402_v16 = vld [vmem:[%s5249_s9 + $0x40] sm:$0xff] }
 0x3af   : > { %3545 = vperm.xlu2 %3850, %v3406_v17   ;;  %v3416_v26 = vmul.f32 %v711_v59, %v402_v16  ;;  %v719_v59 = vadd.f32 %v5505_v7, %v682_v21 }
 0x3d3   : > { %v5239_v34 = vpop.permute.xlu2 %3533 }
 0x3dc   : > { %v3448_v42 = vpop.permute.xlu2 %3447 }
 0x3dd   : > { %v3462_v44 = vmul.f32 %v3448_v42, %v3416_v26  ;;  %v3463_v28 = vmul.f32 %v3448_v42, %v3417_v57  ;;  %v5504_v42 = vld [vmem:[#allocation34_spill] sm:$0xff]  ;;  %v1819_v26 = vadd.f32 %v5064_v5, %v1782_v32  ;;  %v2097_v57 = vadd.f32 %v5136_v62, %v2060_v46  ;;  %v5514_v62 = vld [vmem:[#allocation32_spill] sm:$0xff] }
 0x3de   : > { %v1238_v33 = vadd.f32 %v5504_v42, %v5503_v53  ;;  %v1234_v36 = vadd.f32 %v5514_v62, %v5513_v6  ;;  %v5522_v46 = vld [vmem:[#allocation38_spill] sm:$0xff]  ;;  %v3549_v32 = vmul.f32 %v5239_v34, %v3415_v30  ;;  %v5530_v6 = vld [vmem:[#allocation28_spill] sm:$0xff] }
 0x3e0   : > { %v1275_v10 = vadd.f32 %v5506_v4, %v1238_v33 }
 0x3e5   : > { %v3474_v9 = vpop.permute.xlu2 %3473 }
 0x3e6   : > { %v3486_v55 = vmul.f32 %v3474_v9, %v3418_v51  ;;  %v3487_v1 = vmul.f32 %v3474_v9, %v3419_v45  ;;  %v418_v51 = vld [vmem:[%s5249_s9 + $0xc0] sm:$0xff]  ;;  %v419_v45 = vld [vmem:[%s5249_s9 + $0xc8] sm:$0xff]  ;;  %v420_v9 = vld [vmem:[%s5249_s9 + $0xd0] sm:$0xff] }
 0x3e7   : > { %v3432_v12 = vmul.f32 %v719_v59, %v418_v51  ;;  %v3433_v40 = vmul.f32 %v5515_v14, %v419_v45  ;;  %v3434_v19 = vmul.f32 %v1275_v10, %v420_v9  ;;  %v5525_v51 = vld [vmem:[#allocation33_spill] sm:$0xff]  ;;  %v5526_v9 = vld [vmem:[#allocation43_spill] sm:$0xff] }
 0x3e8   : > { %v3494_v56 = vadd.f32 %v3486_v55, %v3462_v44  ;;  %v5257_v61 = vadd.f32 %v3487_v1, %v3463_v28  ;;  %v678_v44 = vadd.f32 %v5508_v43, %v5507_v24  ;;  %v5509_v28 = vld [vmem:[#allocation52_spill] sm:$0xff]  ;;  %v398_v1 = vld [vmem:[%s5249_s9 + $0x20] sm:$0xff]  ;;  %v1271_v45 = vadd.f32 %v5525_v51, %v1234_v36  ;;  %v5527_v43 = vld [vmem:[#allocation54_spill] sm:$0xff] }
 0x3e9   : > { %v2021_v55 = vadd.f32 %v5509_v28, %v1977_v54  ;;  %v3412_v39 = vmul.f32 %v1819_v26, %v398_v1  ;;  %v5528_v28 = vld [vmem:[#allocation56_spill] sm:$0xff]  ;;  %v416_v36 = vld [vmem:[%s5249_s9 + $0xb0] sm:$0xff] }
 0x3ea   : > { %v715_v5 = vadd.f32 %v5512_v18, %v678_v44 }
 0x3eb   : > { %v3443_v11 = vpop.permute.xlu1 %3442 }
 0x3ec   : > { %v3460_v49 = vmul.f32 %v3443_v11, %v3408_v41  ;;  %v3461_v3 = vmul.f32 %v3443_v11, %v3409_v60  ;;  %v5511_v11 = vld [vmem:[#allocation47_spill] sm:$0xff]  ;;  %v5517_v41 = vld [vmem:[#allocation40_spill] sm:$0xff] }
 0x3ed   : > { %v1937_v35 = vadd.f32 %v5511_v11, %v5510_v63  ;;  %v1929_v60 = vadd.f32 %v5518_v50, %v5517_v41  ;;  %v413_v63 = vld [vmem:[%s5249_s9 + $0x98] sm:$0xff]  ;;  %v414_v11 = vld [vmem:[%s5249_s9 + $0xa0] sm:$0xff] }
 0x3ee   : > { %v5268_v20 = vpop.permute.xlu2 %3509 }
 0x3f3   : > { %v5280_v27 = vpop.permute.xlu0 %3505 }
 0x3f4   : > { %v3518_v22 = vmul.f32 %v5280_v27, %v3420_v52  ;;  %v3435_v52 = vmul.f32 %v5516_v48, %v421_v47  ;;  %v5533_v48 = vld [vmem:[#allocation57_spill] sm:$0xff] }
 0x3f5   : > { %v3470_v2 = vpop.permute.xlu1 %3469 }
 0x3f6   : > { %v5289_v58 = vadd.f32 %v3518_v22, %v3494_v56  ;;  %v3484_v17 = vmul.f32 %v3470_v2, %v3410_v31  ;;  %v3485_v8 = vmul.f32 %v3470_v2, %v3411_v38  ;;  %v399_v56 = vld [vmem:[%s5249_s9 + $0x28] sm:$0xff]  ;;  %v2068_v22 = vadd.f32 %v5519_v37, %v2021_v55  ;;  %v5520_v31 = vld [vmem:[#allocation59_spill] sm:$0xff] }
 0x3f7   : > { %v3458_v15 = vpop.permute.xlu2 %3457  ;;  %v3413_v23 = vmul.f32 %v2097_v57, %v399_v56  ;;  %v3414_v38 = vmul.f32 %v5520_v31, %v400_v29  ;;  %v5529_v29 = vld [vmem:[#allocation48_spill] sm:$0xff] }
 0x3f8   : > { %v3492_v16 = vadd.f32 %v3484_v17, %v3460_v49  ;;  %v3493_v0 = vadd.f32 %v3485_v8, %v3461_v3  ;;  %v5523_v49 = vld [vmem:[#allocation42_spill] sm:$0xff]  ;;  %v5524_v3 = vld [vmem:[#allocation55_spill] sm:$0xff]  ;;  %v3466_v7 = vmul.f32 %v3458_v15, %v3432_v12  ;;  %v3467_v59 = vmul.f32 %v3458_v15, %v3433_v40  ;;  %v417_v12 = vld [vmem:[%s5249_s9 + $0xb8] sm:$0xff] }
 0x3f9   : > { %v1790_v2 = vadd.f32 %v5523_v49, %v5522_v46  ;;  %v1982_v17 = vadd.f32 %v5524_v3, %v1937_v35  ;;  %v3548_v33 = vmul.f32 %v5239_v34, %v3414_v38  ;;  %v2105_v44 = vadd.f32 %v5527_v43, %v2068_v22  ;;  %v410_v34 = vld [vmem:[%s5249_s9 + $0x80] sm:$0xff]  ;;  %v411_v15 = vld [vmem:[%s5249_s9 + $0x88] sm:$0xff]  ;;  %v5531_v40 = vld [vmem:[#allocation36_spill] sm:$0xff] }
 0x3fa   : > { %v415_v35 = vld [vmem:[%s5249_s9 + $0xa8] sm:$0xff]  ;;  %v1972_v25 = vadd.f32 %v5529_v29, %v1929_v60  ;;  %v3424_v18 = vmul.f32 %v715_v5, %v410_v34  ;;  %v3425_v62 = vmul.f32 %v5530_v6, %v411_v15  ;;  %v5534_v5 = vld [vmem:[#allocation39_spill] sm:$0xff]  ;;  %v5536_v46 = vld [vmem:[#allocation61_spill] sm:$0xff] }
 0x3fb   : > { %v1827_v24 = vadd.f32 %v5526_v9, %v1790_v2  ;;  %v2027_v55 = vadd.f32 %v5528_v28, %v1982_v17  ;;  %v3429_v50 = vmul.f32 %v2105_v44, %v415_v35  ;;  %v1794_v30 = vadd.f32 %v5535_v13, %v5534_v5  ;;  %v5537_v2 = vld [vmem:[#allocation65_spill] sm:$0xff]  ;;  %v423_v9 = vld [vmem:[%s5249_s9 + $0xe8] sm:$0xff]  ;;  %v425_v44 = vld [vmem:[%s5249_s9 + $0xf8] sm:$0xff] }
 0x3fc   : > { %v3453_v8 = vpop.permute.xlu0 %3452  ;;  %v3430_v49 = vmul.f32 %v5536_v46, %v416_v36  ;;  %v3431_v3 = vmul.f32 %v5537_v2, %v417_v12  ;;  %v5541_v34 = vld [vmem:[#allocation51_spill] sm:$0xff]  ;;  %v5543_v35 = vld [vmem:[#allocation66_spill] sm:$0xff] }
 0x3fd   : > { %v3428_v41 = vmul.f32 %v1827_v24, %v414_v11  ;;  %v3464_v37 = vmul.f32 %v3453_v8, %v3424_v18  ;;  %v3465_v22 = vmul.f32 %v3453_v8, %v3425_v62  ;;  %v3439_v29 = vmul.f32 %v5543_v35, %v425_v44 }
 0x3fe   : > { %v3502_v21 = vpop.permute.xlu1 %3501 }
 0x3ff   : > { %v3516_v53 = vmul.f32 %v3502_v21, %v3412_v39  ;;  %v3517_v42 = vmul.f32 %v3502_v21, %v3413_v23  ;;  %v3427_v39 = vmul.f32 %v5531_v40, %v413_v63  ;;  %v5532_v23 = vld [vmem:[#allocation49_spill] sm:$0xff]  ;;  %v3520_v17 = vmul.f32 %v5268_v20, %v3428_v41  ;;  %v5542_v63 = vld [vmem:[#allocation62_spill] sm:$0xff] }
 0x400   : > { %v3482_v54 = vpop.permute.xlu2 %3481 }
 0x401   : > { %v3524_v4 = vadd.f32 %v3516_v53, %v3492_v16  ;;  %v3525_v10 = vadd.f32 %v3517_v42, %v3493_v0  ;;  %v3490_v26 = vmul.f32 %v3482_v54, %v3434_v19  ;;  %v3491_v57 = vmul.f32 %v3482_v54, %v3435_v52  ;;  %v412_v0 = vld [vmem:[%s5249_s9 + $0x90] sm:$0xff]  ;;  %v5540_v54 = vld [vmem:[#allocation58_spill] sm:$0xff] }
 0x402   : > { %v3426_v14 = vmul.f32 %v1271_v45, %v412_v0  ;;  %v2015_v19 = vadd.f32 %v5532_v23, %v1972_v25  ;;  %v2072_v52 = vadd.f32 %v5533_v48, %v2027_v55  ;;  %v3521_v53 = vmul.f32 %v5268_v20, %v3429_v50  ;;  %v422_v45 = vld [vmem:[%s5249_s9 + $0xe0] sm:$0xff]  ;;  %v424_v20 = vld [vmem:[%s5249_s9 + $0xf0] sm:$0xff]  ;;  %v407_v0 = vld [vmem:[%s5249_s9 + $0x68] sm:$0xff] }
 0x403   : > { %v3556_v1 = vadd.f32 %v3548_v33, %v3524_v4  ;;  %v3557_v56 = vadd.f32 %v3549_v32, %v3525_v10  ;;  %v3498_v16 = vadd.f32 %v3490_v26, %v3466_v7  ;;  %v3499_v47 = vadd.f32 %v3491_v57, %v3467_v59  ;;  %v5538_v33 = vld [vmem:[#allocation45_spill] sm:$0xff]  ;;  %v5539_v7 = vld [vmem:[#allocation50_spill] sm:$0xff]  ;;  %v408_v23 = vld [vmem:[%s5249_s9 + $0x70] sm:$0xff] }
 0x404   : > { %v1831_v32 = vadd.f32 %v5538_v33, %v1794_v30  ;;  %v2064_v59 = vadd.f32 %v5539_v7, %v2015_v19  ;;  %v2109_v4 = vadd.f32 %v5540_v54, %v2072_v52  ;;  %v3438_v11 = vmul.f32 %v5542_v63, %v424_v20  ;;  %v409_v19 = vld [vmem:[%s5249_s9 + $0x78] sm:$0xff] }
 0x405   : > { %3564 = vst [vmem:[%s5340_s11] sm:$0xff] %v3556_v1  ;;  %v3542_v21 = vpop.permute.xlu0 %3541  ;;  %v5544_v52 = vld [vmem:[#allocation60_spill] sm:$0xff] }
 0x406   : > { %3565 = vst [vmem:[%s5340_s11 + $0x8] sm:$0xff] %v3557_v56  ;;  %v3552_v10 = vmul.f32 %v3542_v21, %v3430_v49  ;;  %v3553_v26 = vmul.f32 %v3542_v21, %v3431_v3  ;;  %v3436_v28 = vmul.f32 %v1831_v32, %v422_v45  ;;  %v3437_v55 = vmul.f32 %v2109_v4, %v423_v9 }
 0x407   : > { %v3478_v60 = vpop.permute.xlu1 %3477  ;;  %v2101_v15 = vadd.f32 %v5541_v34, %v2064_v59 }
 0x408   : > { %v3488_v31 = vmul.f32 %v3478_v60, %v3426_v14  ;;  %v3489_v38 = vmul.f32 %v3478_v60, %v3427_v39 }
 0x409   : > { %v3546_v1 = vpop.permute.xlu2 %3545  ;;  %v3421_v14 = vmul.f32 %v2101_v15, %v407_v0 }
 0x40a   : > { %v3496_v42 = vadd.f32 %v3488_v31, %v3464_v37  ;;  %v3497_v8 = vadd.f32 %v3489_v38, %v3465_v22  ;;  %v3554_v6 = vmul.f32 %v3546_v1, %v3438_v11  ;;  %v3555_v62 = vmul.f32 %v3546_v1, %v3439_v29 }
 0x40b   : > { %v3519_v48 = vmul.f32 %v5280_v27, %v3421_v14 }
 0x40c   : > { %v3528_v57 = vadd.f32 %v3520_v17, %v3496_v42  ;;  %v3529_v51 = vadd.f32 %v3521_v53, %v3497_v8 }
 0x40d   : > { %v3527_v60 = vadd.f32 %v3519_v48, %v5257_v61 }
 0x40e   : > { %v3560_v24 = vadd.f32 %v3552_v10, %v3528_v57  ;;  %v3561_v43 = vadd.f32 %v3553_v26, %v3529_v51 }
 0x410   : > { %3568 = vst [vmem:[%s5340_s11 + $0x20] sm:$0xff] %v3560_v24  ;;  %v3514_v56 = vpop.permute.xlu1 %3513 }
 0x411   : > { %3569 = vst [vmem:[%s5340_s11 + $0x28] sm:$0xff] %v3561_v43  ;;  %v3522_v25 = vmul.f32 %v3514_v56, %v3436_v28  ;;  %v3523_v18 = vmul.f32 %v3514_v56, %v3437_v55 }
 0x413   : > { %v3530_v36 = vadd.f32 %v3522_v25, %v3498_v16  ;;  %v3531_v12 = vadd.f32 %v3523_v18, %v3499_v47  ;;  %v3422_v16 = vmul.f32 %v5544_v52, %v408_v23  ;;  %v5545_v47 = vld [vmem:[#allocation64_spill] sm:$0xff] }
 0x414   : > { %v3423_v41 = vmul.f32 %v5545_v47, %v409_v19 }
 0x415   : > { %v3562_v40 = vadd.f32 %v3554_v6, %v3530_v36  ;;  %v3563_v39 = vadd.f32 %v3555_v62, %v3531_v12 }
 0x417   : > { %3570 = vst [vmem:[%s5340_s11 + $0x30] sm:$0xff] %v3562_v40 }
 0x418   : > { %3571 = vst [vmem:[%s5340_s11 + $0x38] sm:$0xff] %v3563_v39 }
 0x419   : > { %v3538_v50 = vpop.permute.xlu1 %3537 }
 0x41a   : > { %v3550_v27 = vmul.f32 %v3538_v50, %v3422_v16  ;;  %v3551_v37 = vmul.f32 %v3538_v50, %v3423_v41 }
 0x41c   : > { %v3558_v22 = vadd.f32 %v3550_v27, %v5289_v58  ;;  %v3559_v31 = vadd.f32 %v3551_v37, %v3527_v60 }
 0x41e   : > { %3566 = vst [vmem:[%s5340_s11 + $0x10] sm:$0xff] %v3558_v22 }
 0x41f   : > { %3567 = vst [vmem:[%s5340_s11 + $0x18] sm:$0xff] %v3559_v31 }
 0x420   : > { %4044 = shalt.err (!%p4041_p3)
}
 0x421   : > { %s4104_s17 = smov 256   ;;  %s4105_s2 = smov 16  }
 0x422   : > { %3759 = dma.vmem_to_hbm [thread:$0]  (%p4220_p7), %s3586_s0, 1024, %s3588_s4, %s3573_s13, %s4104_s17, %s4104_s17, %s4105_s2  }
 0x423 PF: > { %s3602_s21 = sand.u32 1, %s4079_s23   ;;  %p5547_p5 = scmp.ge.s32.totalorder %s4091_s26, 2 }
 0x424   : > { %s3603_s20 = scalar_lea.sflag [#allocation5], %s3602_s21 }
 0x425   : > { %p3779_p11 = pnand %p5547_p5, %p4179_p6 }
 0x427   : > { %p3780_p12 = pneg %p3779_p11 }
 0x429   : > { %4074 = dma.done.wait (%p3780_p12), %s3603_s20, 1024  }
 0x42a   : > { %4076 = vsyncadd (%p3780_p12), %s3603_s20, 4294966272  ;;  %s5548_s26 = sld [smem:[#allocation19_spill]]  ;;  %s5551_s23 = smov %s4083_s24 }
 0x42b   : > { %s5549_s28 = sld [smem:[#allocation17_spill]] }
 0x42c   : > { %s5550_s25 = sld [smem:[#allocation20_spill]] }
 0x430   : > { %p22_p1 = scmp.ge.s32.totalorder %s5548_s26, 4  }
 0x431   : > { %s5552_s24 = smov %s5549_s28 }
 0x432   :  { %24 = sbr.rel (!%p22_p1) target bundleno = 11 (0xb), region = 113 }
 0x437   :  { %3609 = vsyncpa [#allocation4], 1 }
 0x438   :  { %3611 = vsyncpa [#allocation4 + $0x1], 1 }
 0x439   :  { %3612 = vsyncpa [#allocation7], 1 }
 0x43a   :  { %3613 = vsyncpa [#allocation10], 1 }
 0x43b   :  { %3615 = vsyncpa [#allocation10 + $0x1], 1 }
 0x43c   :  { %3616 = vsyncpa [#allocation5], 1 }
 0x43d   :  { %3618 = vsyncpa [#allocation5 + $0x1], 1 }

</bundles_post_ra>
